<compile_context>
chip_gen: v7x
topology: tpu7x:2x2x1
jax: 0.10.0
libtpu: 0.0.40
codegen_flags: <defaults>
</compile_context>

<pallas_src>
import functools

import numpy as np
import jax
import jax.numpy as jnp
from jax import lax
from jax.experimental import pallas as pl
from jax.experimental.pallas import tpu as pltpu

EPS = 1e-5
_INV_SQRT2 = 0.7071067811865476
_VMEM_LIMIT = 32 * 1024 * 1024   # explicit scoped-VMEM budget, safe on v5e/v6e/v7x


def _erf(x):
    # Abramowitz & Stegun 7.1.26 polynomial, |abs err| <= 1.5e-7.
    # TODO(synk): lax.erf has no guaranteed Mosaic lowering, so exact GELU is
    # reproduced via this polynomial.  The divide is exact: the approx EUP
    # reciprocal used previously was the source of the 2.7e-3 mismatch.
    a1, a2, a3, a4, a5 = 0.254829592, -0.284496736, 1.421413741, -1.453152027, 1.061405429
    p = 0.3275911
    ax = jnp.abs(x)
    t = 1.0 / (1.0 + p * ax)
    poly = ((((a5 * t + a4) * t + a3) * t + a2) * t + a1) * t
    y = 1.0 - poly * jnp.exp(-ax * ax)
    return jnp.where(x >= 0, y, -y)


def _gelu(x):
    return 0.5 * x * (1.0 + _erf(x * _INV_SQRT2))


def _fused_kernel(x_ref, mask_ref, dww_ref, pww_ref, cb_ref,
                  bn1g_ref, bn1b_ref, bn2g_ref, bn2b_ref,
                  m1w_ref, m1b_ref, m2w_ref, m2b_ref,
                  o_ref, *, N, W, HW):
    """Whole SimpleSCALABlock forward: fully VMEM-resident, single launch."""
    C = pww_ref.shape[0]
    inv_count = 1.0 / float(N * HW)

    def fold_bn(s, q, g, b):
        mean = s * inv_count
        var = q * inv_count - mean * mean          # biased (training-mode) variance
        scale = g * lax.rsqrt(var + EPS)
        return scale, b - mean * scale             # (C, 1) each

    # ---- phase A: BN1 statistics over the whole batch ----
    xs = jnp.zeros((C, 1), jnp.float32)
    xq = jnp.zeros((C, 1), jnp.float32)
    for n in range(N):
        xn = x_ref[n]                                        # (C, HW), lane-dense
        xs = xs + jnp.sum(xn, axis=1, keepdims=True)         # lane (XLU) reduction
        xq = xq + jnp.sum(xn * xn, axis=1, keepdims=True)
    s1, t1 = fold_bn(xs, xq, bn1g_ref[...], bn1b_ref[...])

    # Rank-1 depthwise taps: (C,1) per-channel weight * (1,HW) boundary mask.
    taps = [dww_ref[k] * mask_ref[k] for k in range(9)]      # 9 x (C, HW)

    # ---- phase B: BN1 -> depthwise 3x3 -> 1x1 -> +x, plus BN2 statistics ----
    zs = []
    zsum = jnp.zeros((C, 1), jnp.float32)
    zsq = jnp.zeros((C, 1), jnp.float32)
    for n in range(N):
        xn = x_ref[n]
        y = xn * s1 + t1                                     # fused BN1: one FMA
        acc = y * taps[4]                                    # centre tap, no shift
        for k in range(9):
            if k == 4:
                continue
            s = (k // 3 - 1) * W + (k % 3 - 1)
            acc = acc + pltpu.roll(y, shift=(-s) % HW, axis=1) * taps[k]
        # 1x1 channel mix on the MXU (lane-dense RHS); conv1/conv2 biases folded.
        z = jnp.dot(pww_ref[...], acc, preferred_element_type=jnp.float32) + cb_ref[...] + xn
        zs.append(z)                                         # stays in vregs/VMEM
        zsum = zsum + jnp.sum(z, axis=1, keepdims=True)
        zsq = zsq + jnp.sum(z * z, axis=1, keepdims=True)
    s2, t2 = fold_bn(zsum, zsq, bn2g_ref[...], bn2b_ref[...])

    # ---- phase C: BN2 -> MLP (1x1, GELU, 1x1) -> +z ----
    for n in range(N):
        z = zs[n]
        y = z * s2 + t2                                      # fused BN2
        h = jnp.dot(m1w_ref[...], y, preferred_element_type=jnp.float32) + m1b_ref[...]
        h = _gelu(h)                                         # (4C, HW)
        o_ref[n] = (jnp.dot(m2w_ref[...], h, preferred_element_type=jnp.float32)
                    + m2b_ref[...] + z)


def _boundary_mask(H, W):
    """(9, 1, H*W) float mask: tap k valid at pixel p iff neighbour is in-image."""
    hh, ww = np.meshgrid(np.arange(H), np.arange(W), indexing="ij")
    hh = hh.reshape(-1)
    ww = ww.reshape(-1)
    masks = []
    for ky in range(3):
        for kx in range(3):
            dy, dx = ky - 1, kx - 1
            valid = ((hh + dy >= 0) & (hh + dy < H) &
                     (ww + dx >= 0) & (ww + dx < W))
            masks.append(valid.astype(np.float32))
    return np.stack(masks, axis=0)[:, None, :]


def simple_scala_block(x_nchw, kp):
    N, C, H, W = x_nchw.shape
    HW = H * W
    x3 = x_nchw.reshape(N, C, HW).astype(jnp.float32)        # free reshape, no transpose
    mask = jnp.asarray(_boundary_mask(H, W))                 # (9, 1, HW), compile-time const

    # TODO(synk): for large N / HW the batch no longer fits VMEM; tile the batch
    # with a grid (>= ~0.5 MiB blocks), keep z in VMEM scratch, accumulate the BN
    # stats across grid steps (leading phase axis), and split the accumulation
    # per-core on v7x.  Not needed at the benchmarked shape.
    kernel = functools.partial(_fused_kernel, N=N, W=W, HW=HW)
    o3 = pl.pallas_call(
        kernel,
        out_shape=jax.ShapeDtypeStruct((N, C, HW), jnp.float32),
        compiler_params=pltpu.CompilerParams(vmem_limit_bytes=_VMEM_LIMIT),
    )(x3, mask, kp["dw_w"], kp["pw_w"], kp["comb_b"],
      kp["bn1_g"], kp["bn1_b"], kp["bn2_g"], kp["bn2_b"],
      kp["mlp1_w"], kp["mlp1_b"], kp["mlp2_w"], kp["mlp2_b"])
    return o3.reshape(N, C, H, W)


def init_params(key, dim):
    """Deterministic parameters in torch layout + rearranged kernel layout."""
    C = dim
    ks = jax.random.split(key, 12)
    conv1_w = 0.2 * jax.random.normal(ks[0], (C, 1, 3, 3), jnp.float32)    # depthwise
    conv1_b = 0.1 * jax.random.normal(ks[1], (C,), jnp.float32)
    conv2_w = 0.2 * jax.random.normal(ks[2], (C, C, 1, 1), jnp.float32)
    conv2_b = 0.1 * jax.random.normal(ks[3], (C,), jnp.float32)
    bn1_g = 1.0 + 0.1 * jax.random.normal(ks[4], (C,), jnp.float32)
    bn1_b = 0.1 * jax.random.normal(ks[5], (C,), jnp.float32)
    bn2_g = 1.0 + 0.1 * jax.random.normal(ks[6], (C,), jnp.float32)
    bn2_b = 0.1 * jax.random.normal(ks[7], (C,), jnp.float32)
    mlp1_w = 0.2 * jax.random.normal(ks[8], (4 * C, C, 1, 1), jnp.float32)
    mlp1_b = 0.1 * jax.random.normal(ks[9], (4 * C,), jnp.float32)
    mlp2_w = 0.2 * jax.random.normal(ks[10], (C, 4 * C, 1, 1), jnp.float32)
    mlp2_b = 0.1 * jax.random.normal(ks[11], (C,), jnp.float32)

    torch_p = dict(conv1_w=conv1_w, conv1_b=conv1_b, conv2_w=conv2_w, conv2_b=conv2_b,
                   bn1_g=bn1_g, bn1_b=bn1_b, bn2_g=bn2_g, bn2_b=bn2_b,
                   mlp1_w=mlp1_w, mlp1_b=mlp1_b, mlp2_w=mlp2_w, mlp2_b=mlp2_b)

    pw_w = conv2_w[:, :, 0, 0]                               # (Cout, Cin)
    kernel_p = dict(
        dw_w=conv1_w[:, 0].reshape(C, 9).T[:, :, None],      # (9, C, 1), tap k = ky*3+kx
        pw_w=pw_w,                                           # (C, C)
        comb_b=(pw_w @ conv1_b + conv2_b)[:, None],          # conv1_b folded through conv2
        bn1_g=bn1_g[:, None], bn1_b=bn1_b[:, None],          # (C, 1)
        bn2_g=bn2_g[:, None], bn2_b=bn2_b[:, None],
        mlp1_w=mlp1_w[:, :, 0, 0],                           # (4C, C)
        mlp1_b=mlp1_b[:, None],                              # (4C, 1)
        mlp2_w=mlp2_w[:, :, 0, 0],                           # (C, 4C)
        mlp2_b=mlp2_b[:, None],                              # (C, 1)
    )
    return torch_p, kernel_p


def ref_forward(x, p):
    """Pure-JAX reference matching the PyTorch forward (training-mode BN)."""
    C = x.shape[1]
    dn = ("NCHW", "OIHW", "NCHW")

    def bn(y, g, b):
        mean = y.mean(axis=(0, 2, 3), keepdims=True)
        var = ((y - mean) ** 2).mean(axis=(0, 2, 3), keepdims=True)
        return (y - mean) * lax.rsqrt(var + EPS) * g.reshape(1, -1, 1, 1) + b.reshape(1, -1, 1, 1)

    identity = x
    y = bn(x, p["bn1_g"], p["bn1_b"])
    y = lax.conv_general_dilated(y, p["conv1_w"], (1, 1), ((1, 1), (1, 1)),
                                 dimension_numbers=dn, feature_group_count=C)
    y = y + p["conv1_b"].reshape(1, -1, 1, 1)
    y = lax.conv_general_dilated(y, p["conv2_w"], (1, 1), "VALID", dimension_numbers=dn)
    y = y + p["conv2_b"].reshape(1, -1, 1, 1)
    y = y + identity
    identity = y
    y = bn(y, p["bn2_g"], p["bn2_b"])
    y = lax.conv_general_dilated(y, p["mlp1_w"], (1, 1), "VALID", dimension_numbers=dn)
    y = y + p["mlp1_b"].reshape(1, -1, 1, 1)
    y = jax.nn.gelu(y, approximate=False)
    y = lax.conv_general_dilated(y, p["mlp2_w"], (1, 1), "VALID", dimension_numbers=dn)
    y = y + p["mlp2_b"].reshape(1, -1, 1, 1)
    return y + identity


if __name__ == "__main__":
    key = jax.random.PRNGKey(0)
    k_x, k_p = jax.random.split(key)
    N, C, H, W = 2, 8, 16, 16          # small shapes: batch=2, dim=8, 16x16 spatial
    x = jax.random.normal(k_x, (N, C, H, W), jnp.float32)

    torch_p, kernel_p = init_params(k_p, C)

    fwd = jax.jit(simple_scala_block)
    out = jax.block_until_ready(fwd(x, kernel_p))
    ref = jax.block_until_ready(ref_forward(x, torch_p))

    assert out.shape == x.shape
    max_err = float(jnp.max(jnp.abs(out - ref)))
    if max_err > 2e-3:
        raise AssertionError(f"Pallas kernel mismatch vs reference, max abs err = {max_err}")
    print("KERNEL_OK")
</pallas_src>

<mosaic_0001>
module attributes {stable_mosaic.version = 11 : i64} {
  func.func @_fused_kernel(%arg0: memref<2x8x256xf32, #tpu.memory_space<vmem>>, %arg1: memref<9x1x256xf32, #tpu.memory_space<vmem>>, %arg2: memref<9x8x1xf32, #tpu.memory_space<vmem>>, %arg3: memref<8x8xf32, #tpu.memory_space<vmem>>, %arg4: memref<8x1xf32, #tpu.memory_space<vmem>>, %arg5: memref<8x1xf32, #tpu.memory_space<vmem>>, %arg6: memref<8x1xf32, #tpu.memory_space<vmem>>, %arg7: memref<8x1xf32, #tpu.memory_space<vmem>>, %arg8: memref<8x1xf32, #tpu.memory_space<vmem>>, %arg9: memref<32x8xf32, #tpu.memory_space<vmem>>, %arg10: memref<32x1xf32, #tpu.memory_space<vmem>>, %arg11: memref<8x32xf32, #tpu.memory_space<vmem>>, %arg12: memref<8x1xf32, #tpu.memory_space<vmem>>, %arg13: memref<2x8x256xf32, #tpu.memory_space<vmem>>) attributes {dimension_semantics = [], scalar_prefetch = 0 : i64, scratch_operands = 0 : i64, tpu.core_type = #tpu.core_type<tc>} {
    %cst = arith.constant 0.000000e+00 : f32
    %0 = vector.broadcast %cst : f32 to vector<8x1xf32>
    %cst_0 = arith.constant 0.000000e+00 : f32
    %1 = vector.broadcast %cst_0 : f32 to vector<8x1xf32>
    %c0 = arith.constant 0 : index
    %c0_1 = arith.constant 0 : index
    %c0_2 = arith.constant 0 : index
    %2 = vector.load %arg0[%c0, %c0_1, %c0_2] : memref<2x8x256xf32, #tpu.memory_space<vmem>>, vector<1x8x256xf32>
    %3 = vector.shape_cast %2 : vector<1x8x256xf32> to vector<8x256xf32>
    %cst_3 = arith.constant dense<0.000000e+00> : vector<8xf32>
    %4 = vector.multi_reduction <add>, %3, %cst_3 [1] : vector<8x256xf32> to vector<8xf32>
    %5 = vector.shape_cast %4 : vector<8xf32> to vector<8x1xf32>
    %6 = arith.addf %0, %5 : vector<8x1xf32>
    %7 = arith.mulf %3, %3 : vector<8x256xf32>
    %cst_4 = arith.constant dense<0.000000e+00> : vector<8xf32>
    %8 = vector.multi_reduction <add>, %7, %cst_4 [1] : vector<8x256xf32> to vector<8xf32>
    %9 = vector.shape_cast %8 : vector<8xf32> to vector<8x1xf32>
    %10 = arith.addf %1, %9 : vector<8x1xf32>
    %c1 = arith.constant 1 : index
    %c0_5 = arith.constant 0 : index
    %c0_6 = arith.constant 0 : index
    %11 = vector.load %arg0[%c1, %c0_5, %c0_6] : memref<2x8x256xf32, #tpu.memory_space<vmem>>, vector<1x8x256xf32>
    %12 = vector.shape_cast %11 : vector<1x8x256xf32> to vector<8x256xf32>
    %cst_7 = arith.constant dense<0.000000e+00> : vector<8xf32>
    %13 = vector.multi_reduction <add>, %12, %cst_7 [1] : vector<8x256xf32> to vector<8xf32>
    %14 = vector.shape_cast %13 : vector<8xf32> to vector<8x1xf32>
    %15 = arith.addf %6, %14 : vector<8x1xf32>
    %16 = arith.mulf %12, %12 : vector<8x256xf32>
    %cst_8 = arith.constant dense<0.000000e+00> : vector<8xf32>
    %17 = vector.multi_reduction <add>, %16, %cst_8 [1] : vector<8x256xf32> to vector<8xf32>
    %18 = vector.shape_cast %17 : vector<8xf32> to vector<8x1xf32>
    %19 = arith.addf %10, %18 : vector<8x1xf32>
    %c0_9 = arith.constant 0 : index
    %c0_10 = arith.constant 0 : index
    %20 = vector.load %arg5[%c0_9, %c0_10] : memref<8x1xf32, #tpu.memory_space<vmem>>, vector<8x1xf32>
    %c0_11 = arith.constant 0 : index
    %c0_12 = arith.constant 0 : index
    %21 = vector.load %arg6[%c0_11, %c0_12] : memref<8x1xf32, #tpu.memory_space<vmem>>, vector<8x1xf32>
    %cst_13 = arith.constant 0.001953125 : f32
    %22 = vector.broadcast %cst_13 : f32 to vector<8x1xf32>
    %23 = arith.mulf %15, %22 : vector<8x1xf32>
    %cst_14 = arith.constant 0.001953125 : f32
    %24 = vector.broadcast %cst_14 : f32 to vector<8x1xf32>
    %25 = arith.mulf %19, %24 : vector<8x1xf32>
    %26 = arith.mulf %23, %23 : vector<8x1xf32>
    %27 = arith.subf %25, %26 : vector<8x1xf32>
    %cst_15 = arith.constant 9.99999974E-6 : f32
    %28 = vector.broadcast %cst_15 : f32 to vector<8x1xf32>
    %29 = arith.addf %27, %28 : vector<8x1xf32>
    %30 = math.rsqrt %29 : vector<8x1xf32>
    %31 = arith.mulf %20, %30 : vector<8x1xf32>
    %32 = arith.mulf %23, %31 : vector<8x1xf32>
    %33 = arith.subf %21, %32 : vector<8x1xf32>
    %c0_16 = arith.constant 0 : index
    %c0_17 = arith.constant 0 : index
    %c0_18 = arith.constant 0 : index
    %34 = vector.load %arg2[%c0_16, %c0_17, %c0_18] : memref<9x8x1xf32, #tpu.memory_space<vmem>>, vector<1x8x1xf32>
    %35 = vector.shape_cast %34 : vector<1x8x1xf32> to vector<8x1xf32>
    %c0_19 = arith.constant 0 : index
    %c0_20 = arith.constant 0 : index
    %c0_21 = arith.constant 0 : index
    %36 = vector.load %arg1[%c0_19, %c0_20, %c0_21] : memref<9x1x256xf32, #tpu.memory_space<vmem>>, vector<1x1x256xf32>
    %37 = vector.shape_cast %36 : vector<1x1x256xf32> to vector<1x256xf32>
    %38 = vector.broadcast %35 : vector<8x1xf32> to vector<8x256xf32>
    %39 = vector.broadcast %37 : vector<1x256xf32> to vector<8x256xf32>
    %40 = arith.mulf %38, %39 : vector<8x256xf32>
    %c1_22 = arith.constant 1 : index
    %c0_23 = arith.constant 0 : index
    %c0_24 = arith.constant 0 : index
    %41 = vector.load %arg2[%c1_22, %c0_23, %c0_24] : memref<9x8x1xf32, #tpu.memory_space<vmem>>, vector<1x8x1xf32>
    %42 = vector.shape_cast %41 : vector<1x8x1xf32> to vector<8x1xf32>
    %c1_25 = arith.constant 1 : index
    %c0_26 = arith.constant 0 : index
    %c0_27 = arith.constant 0 : index
    %43 = vector.load %arg1[%c1_25, %c0_26, %c0_27] : memref<9x1x256xf32, #tpu.memory_space<vmem>>, vector<1x1x256xf32>
    %44 = vector.shape_cast %43 : vector<1x1x256xf32> to vector<1x256xf32>
    %45 = vector.broadcast %42 : vector<8x1xf32> to vector<8x256xf32>
    %46 = vector.broadcast %44 : vector<1x256xf32> to vector<8x256xf32>
    %47 = arith.mulf %45, %46 : vector<8x256xf32>
    %c2 = arith.constant 2 : index
    %c0_28 = arith.constant 0 : index
    %c0_29 = arith.constant 0 : index
    %48 = vector.load %arg2[%c2, %c0_28, %c0_29] : memref<9x8x1xf32, #tpu.memory_space<vmem>>, vector<1x8x1xf32>
    %49 = vector.shape_cast %48 : vector<1x8x1xf32> to vector<8x1xf32>
    %c2_30 = arith.constant 2 : index
    %c0_31 = arith.constant 0 : index
    %c0_32 = arith.constant 0 : index
    %50 = vector.load %arg1[%c2_30, %c0_31, %c0_32] : memref<9x1x256xf32, #tpu.memory_space<vmem>>, vector<1x1x256xf32>
    %51 = vector.shape_cast %50 : vector<1x1x256xf32> to vector<1x256xf32>
    %52 = vector.broadcast %49 : vector<8x1xf32> to vector<8x256xf32>
    %53 = vector.broadcast %51 : vector<1x256xf32> to vector<8x256xf32>
    %54 = arith.mulf %52, %53 : vector<8x256xf32>
    %c3 = arith.constant 3 : index
    %c0_33 = arith.constant 0 : index
    %c0_34 = arith.constant 0 : index
    %55 = vector.load %arg2[%c3, %c0_33, %c0_34] : memref<9x8x1xf32, #tpu.memory_space<vmem>>, vector<1x8x1xf32>
    %56 = vector.shape_cast %55 : vector<1x8x1xf32> to vector<8x1xf32>
    %c3_35 = arith.constant 3 : index
    %c0_36 = arith.constant 0 : index
    %c0_37 = arith.constant 0 : index
    %57 = vector.load %arg1[%c3_35, %c0_36, %c0_37] : memref<9x1x256xf32, #tpu.memory_space<vmem>>, vector<1x1x256xf32>
    %58 = vector.shape_cast %57 : vector<1x1x256xf32> to vector<1x256xf32>
    %59 = vector.broadcast %56 : vector<8x1xf32> to vector<8x256xf32>
    %60 = vector.broadcast %58 : vector<1x256xf32> to vector<8x256xf32>
    %61 = arith.mulf %59, %60 : vector<8x256xf32>
    %c4 = arith.constant 4 : index
    %c0_38 = arith.constant 0 : index
    %c0_39 = arith.constant 0 : index
    %62 = vector.load %arg2[%c4, %c0_38, %c0_39] : memref<9x8x1xf32, #tpu.memory_space<vmem>>, vector<1x8x1xf32>
    %63 = vector.shape_cast %62 : vector<1x8x1xf32> to vector<8x1xf32>
    %c4_40 = arith.constant 4 : index
    %c0_41 = arith.constant 0 : index
    %c0_42 = arith.constant 0 : index
    %64 = vector.load %arg1[%c4_40, %c0_41, %c0_42] : memref<9x1x256xf32, #tpu.memory_space<vmem>>, vector<1x1x256xf32>
    %65 = vector.shape_cast %64 : vector<1x1x256xf32> to vector<1x256xf32>
    %66 = vector.broadcast %63 : vector<8x1xf32> to vector<8x256xf32>
    %67 = vector.broadcast %65 : vector<1x256xf32> to vector<8x256xf32>
    %68 = arith.mulf %66, %67 : vector<8x256xf32>
    %c5 = arith.constant 5 : index
    %c0_43 = arith.constant 0 : index
    %c0_44 = arith.constant 0 : index
    %69 = vector.load %arg2[%c5, %c0_43, %c0_44] : memref<9x8x1xf32, #tpu.memory_space<vmem>>, vector<1x8x1xf32>
    %70 = vector.shape_cast %69 : vector<1x8x1xf32> to vector<8x1xf32>
    %c5_45 = arith.constant 5 : index
    %c0_46 = arith.constant 0 : index
    %c0_47 = arith.constant 0 : index
    %71 = vector.load %arg1[%c5_45, %c0_46, %c0_47] : memref<9x1x256xf32, #tpu.memory_space<vmem>>, vector<1x1x256xf32>
    %72 = vector.shape_cast %71 : vector<1x1x256xf32> to vector<1x256xf32>
    %73 = vector.broadcast %70 : vector<8x1xf32> to vector<8x256xf32>
    %74 = vector.broadcast %72 : vector<1x256xf32> to vector<8x256xf32>
    %75 = arith.mulf %73, %74 : vector<8x256xf32>
    %c6 = arith.constant 6 : index
    %c0_48 = arith.constant 0 : index
    %c0_49 = arith.constant 0 : index
    %76 = vector.load %arg2[%c6, %c0_48, %c0_49] : memref<9x8x1xf32, #tpu.memory_space<vmem>>, vector<1x8x1xf32>
    %77 = vector.shape_cast %76 : vector<1x8x1xf32> to vector<8x1xf32>
    %c6_50 = arith.constant 6 : index
    %c0_51 = arith.constant 0 : index
    %c0_52 = arith.constant 0 : index
    %78 = vector.load %arg1[%c6_50, %c0_51, %c0_52] : memref<9x1x256xf32, #tpu.memory_space<vmem>>, vector<1x1x256xf32>
    %79 = vector.shape_cast %78 : vector<1x1x256xf32> to vector<1x256xf32>
    %80 = vector.broadcast %77 : vector<8x1xf32> to vector<8x256xf32>
    %81 = vector.broadcast %79 : vector<1x256xf32> to vector<8x256xf32>
    %82 = arith.mulf %80, %81 : vector<8x256xf32>
    %c7 = arith.constant 7 : index
    %c0_53 = arith.constant 0 : index
    %c0_54 = arith.constant 0 : index
    %83 = vector.load %arg2[%c7, %c0_53, %c0_54] : memref<9x8x1xf32, #tpu.memory_space<vmem>>, vector<1x8x1xf32>
    %84 = vector.shape_cast %83 : vector<1x8x1xf32> to vector<8x1xf32>
    %c7_55 = arith.constant 7 : index
    %c0_56 = arith.constant 0 : index
    %c0_57 = arith.constant 0 : index
    %85 = vector.load %arg1[%c7_55, %c0_56, %c0_57] : memref<9x1x256xf32, #tpu.memory_space<vmem>>, vector<1x1x256xf32>
    %86 = vector.shape_cast %85 : vector<1x1x256xf32> to vector<1x256xf32>
    %87 = vector.broadcast %84 : vector<8x1xf32> to vector<8x256xf32>
    %88 = vector.broadcast %86 : vector<1x256xf32> to vector<8x256xf32>
    %89 = arith.mulf %87, %88 : vector<8x256xf32>
    %c8 = arith.constant 8 : index
    %c0_58 = arith.constant 0 : index
    %c0_59 = arith.constant 0 : index
    %90 = vector.load %arg2[%c8, %c0_58, %c0_59] : memref<9x8x1xf32, #tpu.memory_space<vmem>>, vector<1x8x1xf32>
    %91 = vector.shape_cast %90 : vector<1x8x1xf32> to vector<8x1xf32>
    %c8_60 = arith.constant 8 : index
    %c0_61 = arith.constant 0 : index
    %c0_62 = arith.constant 0 : index
    %92 = vector.load %arg1[%c8_60, %c0_61, %c0_62] : memref<9x1x256xf32, #tpu.memory_space<vmem>>, vector<1x1x256xf32>
    %93 = vector.shape_cast %92 : vector<1x1x256xf32> to vector<1x256xf32>
    %94 = vector.broadcast %91 : vector<8x1xf32> to vector<8x256xf32>
    %95 = vector.broadcast %93 : vector<1x256xf32> to vector<8x256xf32>
    %96 = arith.mulf %94, %95 : vector<8x256xf32>
    %cst_63 = arith.constant 0.000000e+00 : f32
    %97 = vector.broadcast %cst_63 : f32 to vector<8x1xf32>
    %cst_64 = arith.constant 0.000000e+00 : f32
    %98 = vector.broadcast %cst_64 : f32 to vector<8x1xf32>
    %c0_65 = arith.constant 0 : index
    %c0_66 = arith.constant 0 : index
    %c0_67 = arith.constant 0 : index
    %99 = vector.load %arg0[%c0_65, %c0_66, %c0_67] : memref<2x8x256xf32, #tpu.memory_space<vmem>>, vector<1x8x256xf32>
    %100 = vector.shape_cast %99 : vector<1x8x256xf32> to vector<8x256xf32>
    %101 = vector.broadcast %31 : vector<8x1xf32> to vector<8x256xf32>
    %102 = arith.mulf %100, %101 : vector<8x256xf32>
    %103 = vector.broadcast %33 : vector<8x1xf32> to vector<8x256xf32>
    %104 = arith.addf %102, %103 : vector<8x256xf32>
    %105 = arith.mulf %104, %68 : vector<8x256xf32>
    %c17_i32 = arith.constant 17 : i32
    %106 = tpu.dynamic_rotate %104 by %c17_i32 dim 1 : vector<8x256xf32>, i32 -> vector<8x256xf32>
    %107 = arith.mulf %106, %40 : vector<8x256xf32>
    %108 = arith.addf %105, %107 : vector<8x256xf32>
    %c16_i32 = arith.constant 16 : i32
    %109 = tpu.dynamic_rotate %104 by %c16_i32 dim 1 : vector<8x256xf32>, i32 -> vector<8x256xf32>
    %110 = arith.mulf %109, %47 : vector<8x256xf32>
    %111 = arith.addf %108, %110 : vector<8x256xf32>
    %c15_i32 = arith.constant 15 : i32
    %112 = tpu.dynamic_rotate %104 by %c15_i32 dim 1 : vector<8x256xf32>, i32 -> vector<8x256xf32>
    %113 = arith.mulf %112, %54 : vector<8x256xf32>
    %114 = arith.addf %111, %113 : vector<8x256xf32>
    %c1_i32 = arith.constant 1 : i32
    %115 = tpu.dynamic_rotate %104 by %c1_i32 dim 1 : vector<8x256xf32>, i32 -> vector<8x256xf32>
    %116 = arith.mulf %115, %61 : vector<8x256xf32>
    %117 = arith.addf %114, %116 : vector<8x256xf32>
    %c255_i32 = arith.constant 255 : i32
    %118 = tpu.dynamic_rotate %104 by %c255_i32 dim 1 : vector<8x256xf32>, i32 -> vector<8x256xf32>
    %119 = arith.mulf %118, %75 : vector<8x256xf32>
    %120 = arith.addf %117, %119 : vector<8x256xf32>
    %c241_i32 = arith.constant 241 : i32
    %121 = tpu.dynamic_rotate %104 by %c241_i32 dim 1 : vector<8x256xf32>, i32 -> vector<8x256xf32>
    %122 = arith.mulf %121, %82 : vector<8x256xf32>
    %123 = arith.addf %120, %122 : vector<8x256xf32>
    %c240_i32 = arith.constant 240 : i32
    %124 = tpu.dynamic_rotate %104 by %c240_i32 dim 1 : vector<8x256xf32>, i32 -> vector<8x256xf32>
    %125 = arith.mulf %124, %89 : vector<8x256xf32>
    %126 = arith.addf %123, %125 : vector<8x256xf32>
    %c239_i32 = arith.constant 239 : i32
    %127 = tpu.dynamic_rotate %104 by %c239_i32 dim 1 : vector<8x256xf32>, i32 -> vector<8x256xf32>
    %128 = arith.mulf %127, %96 : vector<8x256xf32>
    %129 = arith.addf %126, %128 : vector<8x256xf32>
    %c0_68 = arith.constant 0 : index
    %c0_69 = arith.constant 0 : index
    %130 = vector.load %arg3[%c0_68, %c0_69] : memref<8x8xf32, #tpu.memory_space<vmem>>, vector<8x8xf32>
    %cst_70 = arith.constant dense<0.000000e+00> : vector<8x256xf32>
    %131 = tpu.matmul %130, %129, %cst_70 {dimension_numbers = #tpu.dot_dimension_numbers<[1], [0], [0], [1], [0, 0, 1, 1], [], []>} : vector<8x8xf32>, vector<8x256xf32>, vector<8x256xf32> -> vector<8x256xf32>
    %c0_71 = arith.constant 0 : index
    %c0_72 = arith.constant 0 : index
    %132 = vector.load %arg4[%c0_71, %c0_72] : memref<8x1xf32, #tpu.memory_space<vmem>>, vector<8x1xf32>
    %133 = vector.broadcast %132 : vector<8x1xf32> to vector<8x256xf32>
    %134 = arith.addf %131, %133 : vector<8x256xf32>
    %135 = arith.addf %134, %100 : vector<8x256xf32>
    %cst_73 = arith.constant dense<0.000000e+00> : vector<8xf32>
    %136 = vector.multi_reduction <add>, %135, %cst_73 [1] : vector<8x256xf32> to vector<8xf32>
    %137 = vector.shape_cast %136 : vector<8xf32> to vector<8x1xf32>
    %138 = arith.addf %97, %137 : vector<8x1xf32>
    %139 = arith.mulf %135, %135 : vector<8x256xf32>
    %cst_74 = arith.constant dense<0.000000e+00> : vector<8xf32>
    %140 = vector.multi_reduction <add>, %139, %cst_74 [1] : vector<8x256xf32> to vector<8xf32>
    %141 = vector.shape_cast %140 : vector<8xf32> to vector<8x1xf32>
    %142 = arith.addf %98, %141 : vector<8x1xf32>
    %c1_75 = arith.constant 1 : index
    %c0_76 = arith.constant 0 : index
    %c0_77 = arith.constant 0 : index
    %143 = vector.load %arg0[%c1_75, %c0_76, %c0_77] : memref<2x8x256xf32, #tpu.memory_space<vmem>>, vector<1x8x256xf32>
    %144 = vector.shape_cast %143 : vector<1x8x256xf32> to vector<8x256xf32>
    %145 = vector.broadcast %31 : vector<8x1xf32> to vector<8x256xf32>
    %146 = arith.mulf %144, %145 : vector<8x256xf32>
    %147 = vector.broadcast %33 : vector<8x1xf32> to vector<8x256xf32>
    %148 = arith.addf %146, %147 : vector<8x256xf32>
    %149 = arith.mulf %148, %68 : vector<8x256xf32>
    %c17_i32_78 = arith.constant 17 : i32
    %150 = tpu.dynamic_rotate %148 by %c17_i32_78 dim 1 : vector<8x256xf32>, i32 -> vector<8x256xf32>
    %151 = arith.mulf %150, %40 : vector<8x256xf32>
    %152 = arith.addf %149, %151 : vector<8x256xf32>
    %c16_i32_79 = arith.constant 16 : i32
    %153 = tpu.dynamic_rotate %148 by %c16_i32_79 dim 1 : vector<8x256xf32>, i32 -> vector<8x256xf32>
    %154 = arith.mulf %153, %47 : vector<8x256xf32>
    %155 = arith.addf %152, %154 : vector<8x256xf32>
    %c15_i32_80 = arith.constant 15 : i32
    %156 = tpu.dynamic_rotate %148 by %c15_i32_80 dim 1 : vector<8x256xf32>, i32 -> vector<8x256xf32>
    %157 = arith.mulf %156, %54 : vector<8x256xf32>
    %158 = arith.addf %155, %157 : vector<8x256xf32>
    %c1_i32_81 = arith.constant 1 : i32
    %159 = tpu.dynamic_rotate %148 by %c1_i32_81 dim 1 : vector<8x256xf32>, i32 -> vector<8x256xf32>
    %160 = arith.mulf %159, %61 : vector<8x256xf32>
    %161 = arith.addf %158, %160 : vector<8x256xf32>
    %c255_i32_82 = arith.constant 255 : i32
    %162 = tpu.dynamic_rotate %148 by %c255_i32_82 dim 1 : vector<8x256xf32>, i32 -> vector<8x256xf32>
    %163 = arith.mulf %162, %75 : vector<8x256xf32>
    %164 = arith.addf %161, %163 : vector<8x256xf32>
    %c241_i32_83 = arith.constant 241 : i32
    %165 = tpu.dynamic_rotate %148 by %c241_i32_83 dim 1 : vector<8x256xf32>, i32 -> vector<8x256xf32>
    %166 = arith.mulf %165, %82 : vector<8x256xf32>
    %167 = arith.addf %164, %166 : vector<8x256xf32>
    %c240_i32_84 = arith.constant 240 : i32
    %168 = tpu.dynamic_rotate %148 by %c240_i32_84 dim 1 : vector<8x256xf32>, i32 -> vector<8x256xf32>
    %169 = arith.mulf %168, %89 : vector<8x256xf32>
    %170 = arith.addf %167, %169 : vector<8x256xf32>
    %c239_i32_85 = arith.constant 239 : i32
    %171 = tpu.dynamic_rotate %148 by %c239_i32_85 dim 1 : vector<8x256xf32>, i32 -> vector<8x256xf32>
    %172 = arith.mulf %171, %96 : vector<8x256xf32>
    %173 = arith.addf %170, %172 : vector<8x256xf32>
    %c0_86 = arith.constant 0 : index
    %c0_87 = arith.constant 0 : index
    %174 = vector.load %arg3[%c0_86, %c0_87] : memref<8x8xf32, #tpu.memory_space<vmem>>, vector<8x8xf32>
    %cst_88 = arith.constant dense<0.000000e+00> : vector<8x256xf32>
    %175 = tpu.matmul %174, %173, %cst_88 {dimension_numbers = #tpu.dot_dimension_numbers<[1], [0], [0], [1], [0, 0, 1, 1], [], []>} : vector<8x8xf32>, vector<8x256xf32>, vector<8x256xf32> -> vector<8x256xf32>
    %c0_89 = arith.constant 0 : index
    %c0_90 = arith.constant 0 : index
    %176 = vector.load %arg4[%c0_89, %c0_90] : memref<8x1xf32, #tpu.memory_space<vmem>>, vector<8x1xf32>
    %177 = vector.broadcast %176 : vector<8x1xf32> to vector<8x256xf32>
    %178 = arith.addf %175, %177 : vector<8x256xf32>
    %179 = arith.addf %178, %144 : vector<8x256xf32>
    %cst_91 = arith.constant dense<0.000000e+00> : vector<8xf32>
    %180 = vector.multi_reduction <add>, %179, %cst_91 [1] : vector<8x256xf32> to vector<8xf32>
    %181 = vector.shape_cast %180 : vector<8xf32> to vector<8x1xf32>
    %182 = arith.addf %138, %181 : vector<8x1xf32>
    %183 = arith.mulf %179, %179 : vector<8x256xf32>
    %cst_92 = arith.constant dense<0.000000e+00> : vector<8xf32>
    %184 = vector.multi_reduction <add>, %183, %cst_92 [1] : vector<8x256xf32> to vector<8xf32>
    %185 = vector.shape_cast %184 : vector<8xf32> to vector<8x1xf32>
    %186 = arith.addf %142, %185 : vector<8x1xf32>
    %c0_93 = arith.constant 0 : index
    %c0_94 = arith.constant 0 : index
    %187 = vector.load %arg7[%c0_93, %c0_94] : memref<8x1xf32, #tpu.memory_space<vmem>>, vector<8x1xf32>
    %c0_95 = arith.constant 0 : index
    %c0_96 = arith.constant 0 : index
    %188 = vector.load %arg8[%c0_95, %c0_96] : memref<8x1xf32, #tpu.memory_space<vmem>>, vector<8x1xf32>
    %cst_97 = arith.constant 0.001953125 : f32
    %189 = vector.broadcast %cst_97 : f32 to vector<8x1xf32>
    %190 = arith.mulf %182, %189 : vector<8x1xf32>
    %cst_98 = arith.constant 0.001953125 : f32
    %191 = vector.broadcast %cst_98 : f32 to vector<8x1xf32>
    %192 = arith.mulf %186, %191 : vector<8x1xf32>
    %193 = arith.mulf %190, %190 : vector<8x1xf32>
    %194 = arith.subf %192, %193 : vector<8x1xf32>
    %cst_99 = arith.constant 9.99999974E-6 : f32
    %195 = vector.broadcast %cst_99 : f32 to vector<8x1xf32>
    %196 = arith.addf %194, %195 : vector<8x1xf32>
    %197 = math.rsqrt %196 : vector<8x1xf32>
    %198 = arith.mulf %187, %197 : vector<8x1xf32>
    %199 = arith.mulf %190, %198 : vector<8x1xf32>
    %200 = arith.subf %188, %199 : vector<8x1xf32>
    %201 = vector.broadcast %198 : vector<8x1xf32> to vector<8x256xf32>
    %202 = arith.mulf %135, %201 : vector<8x256xf32>
    %203 = vector.broadcast %200 : vector<8x1xf32> to vector<8x256xf32>
    %204 = arith.addf %202, %203 : vector<8x256xf32>
    %c0_100 = arith.constant 0 : index
    %c0_101 = arith.constant 0 : index
    %205 = vector.load %arg9[%c0_100, %c0_101] : memref<32x8xf32, #tpu.memory_space<vmem>>, vector<32x8xf32>
    %cst_102 = arith.constant dense<0.000000e+00> : vector<32x256xf32>
    %206 = tpu.matmul %205, %204, %cst_102 {dimension_numbers = #tpu.dot_dimension_numbers<[1], [0], [0], [1], [0, 0, 1, 1], [], []>} : vector<32x8xf32>, vector<8x256xf32>, vector<32x256xf32> -> vector<32x256xf32>
    %c0_103 = arith.constant 0 : index
    %c0_104 = arith.constant 0 : index
    %207 = vector.load %arg10[%c0_103, %c0_104] : memref<32x1xf32, #tpu.memory_space<vmem>>, vector<32x1xf32>
    %208 = vector.broadcast %207 : vector<32x1xf32> to vector<32x256xf32>
    %209 = arith.addf %206, %208 : vector<32x256xf32>
    %cst_105 = arith.constant 5.000000e-01 : f32
    %210 = vector.broadcast %cst_105 : f32 to vector<32x256xf32>
    %211 = arith.mulf %210, %209 : vector<32x256xf32>
    %cst_106 = arith.constant 0.707106769 : f32
    %212 = vector.broadcast %cst_106 : f32 to vector<32x256xf32>
    %213 = arith.mulf %209, %212 : vector<32x256xf32>
    %214 = math.absf %213 : vector<32x256xf32>
    %cst_107 = arith.constant 0.327591091 : f32
    %215 = vector.broadcast %cst_107 : f32 to vector<32x256xf32>
    %216 = arith.mulf %215, %214 : vector<32x256xf32>
    %cst_108 = arith.constant 1.000000e+00 : f32
    %217 = vector.broadcast %cst_108 : f32 to vector<32x256xf32>
    %218 = arith.addf %217, %216 : vector<32x256xf32>
    %cst_109 = arith.constant 1.000000e+00 : f32
    %219 = vector.broadcast %cst_109 : f32 to vector<32x256xf32>
    %220 = arith.divf %219, %218 : vector<32x256xf32>
    %cst_110 = arith.constant 1.06140542 : f32
    %221 = vector.broadcast %cst_110 : f32 to vector<32x256xf32>
    %222 = arith.mulf %221, %220 : vector<32x256xf32>
    %cst_111 = arith.constant -1.45315206 : f32
    %223 = vector.broadcast %cst_111 : f32 to vector<32x256xf32>
    %224 = arith.addf %222, %223 : vector<32x256xf32>
    %225 = arith.mulf %224, %220 : vector<32x256xf32>
    %cst_112 = arith.constant 1.42141378 : f32
    %226 = vector.broadcast %cst_112 : f32 to vector<32x256xf32>
    %227 = arith.addf %225, %226 : vector<32x256xf32>
    %228 = arith.mulf %227, %220 : vector<32x256xf32>
    %cst_113 = arith.constant -0.284496725 : f32
    %229 = vector.broadcast %cst_113 : f32 to vector<32x256xf32>
    %230 = arith.addf %228, %229 : vector<32x256xf32>
    %231 = arith.mulf %230, %220 : vector<32x256xf32>
    %cst_114 = arith.constant 0.254829586 : f32
    %232 = vector.broadcast %cst_114 : f32 to vector<32x256xf32>
    %233 = arith.addf %231, %232 : vector<32x256xf32>
    %234 = arith.mulf %233, %220 : vector<32x256xf32>
    %cst_115 = arith.constant 0.000000e+00 : f32
    %235 = vector.broadcast %cst_115 : f32 to vector<32x256xf32>
    %236 = arith.subf %235, %214 : vector<32x256xf32>
    %237 = arith.mulf %236, %214 : vector<32x256xf32>
    %238 = math.exp %237 : vector<32x256xf32>
    %239 = arith.mulf %234, %238 : vector<32x256xf32>
    %cst_116 = arith.constant 1.000000e+00 : f32
    %240 = vector.broadcast %cst_116 : f32 to vector<32x256xf32>
    %241 = arith.subf %240, %239 : vector<32x256xf32>
    %cst_117 = arith.constant 0.000000e+00 : f32
    %242 = vector.broadcast %cst_117 : f32 to vector<32x256xf32>
    %243 = arith.cmpf oge, %213, %242 : vector<32x256xf32>
    %cst_118 = arith.constant 0.000000e+00 : f32
    %244 = vector.broadcast %cst_118 : f32 to vector<32x256xf32>
    %245 = arith.subf %244, %241 : vector<32x256xf32>
    %246 = arith.select %243, %241, %245 : vector<32x256xi1>, vector<32x256xf32>
    %cst_119 = arith.constant 1.000000e+00 : f32
    %247 = vector.broadcast %cst_119 : f32 to vector<32x256xf32>
    %248 = arith.addf %247, %246 : vector<32x256xf32>
    %249 = arith.mulf %211, %248 : vector<32x256xf32>
    %c0_120 = arith.constant 0 : index
    %c0_121 = arith.constant 0 : index
    %250 = vector.load %arg11[%c0_120, %c0_121] : memref<8x32xf32, #tpu.memory_space<vmem>>, vector<8x32xf32>
    %cst_122 = arith.constant dense<0.000000e+00> : vector<8x256xf32>
    %251 = tpu.matmul %250, %249, %cst_122 {dimension_numbers = #tpu.dot_dimension_numbers<[1], [0], [0], [1], [0, 0, 1, 1], [], []>} : vector<8x32xf32>, vector<32x256xf32>, vector<8x256xf32> -> vector<8x256xf32>
    %c0_123 = arith.constant 0 : index
    %c0_124 = arith.constant 0 : index
    %252 = vector.load %arg12[%c0_123, %c0_124] : memref<8x1xf32, #tpu.memory_space<vmem>>, vector<8x1xf32>
    %253 = vector.broadcast %252 : vector<8x1xf32> to vector<8x256xf32>
    %254 = arith.addf %251, %253 : vector<8x256xf32>
    %255 = arith.addf %254, %135 : vector<8x256xf32>
    %c0_125 = arith.constant 0 : index
    %c0_126 = arith.constant 0 : index
    %c0_127 = arith.constant 0 : index
    %256 = vector.load %arg13[%c0_125, %c0_126, %c0_127] : memref<2x8x256xf32, #tpu.memory_space<vmem>>, vector<1x8x256xf32>
    %257 = vector.shape_cast %256 : vector<1x8x256xf32> to vector<8x256xf32>
    %258 = vector.shape_cast %255 : vector<8x256xf32> to vector<1x8x256xf32>
    tpu.vector_store %arg13[%c0_125, %c0_126, %c0_127], %258 {strides = array<i32>} : memref<2x8x256xf32, #tpu.memory_space<vmem>>, vector<1x8x256xf32>,
    %259 = vector.broadcast %198 : vector<8x1xf32> to vector<8x256xf32>
    %260 = arith.mulf %179, %259 : vector<8x256xf32>
    %261 = vector.broadcast %200 : vector<8x1xf32> to vector<8x256xf32>
    %262 = arith.addf %260, %261 : vector<8x256xf32>
    %c0_128 = arith.constant 0 : index
    %c0_129 = arith.constant 0 : index
    %263 = vector.load %arg9[%c0_128, %c0_129] : memref<32x8xf32, #tpu.memory_space<vmem>>, vector<32x8xf32>
    %cst_130 = arith.constant dense<0.000000e+00> : vector<32x256xf32>
    %264 = tpu.matmul %263, %262, %cst_130 {dimension_numbers = #tpu.dot_dimension_numbers<[1], [0], [0], [1], [0, 0, 1, 1], [], []>} : vector<32x8xf32>, vector<8x256xf32>, vector<32x256xf32> -> vector<32x256xf32>
    %c0_131 = arith.constant 0 : index
    %c0_132 = arith.constant 0 : index
    %265 = vector.load %arg10[%c0_131, %c0_132] : memref<32x1xf32, #tpu.memory_space<vmem>>, vector<32x1xf32>
    %266 = vector.broadcast %265 : vector<32x1xf32> to vector<32x256xf32>
    %267 = arith.addf %264, %266 : vector<32x256xf32>
    %cst_133 = arith.constant 5.000000e-01 : f32
    %268 = vector.broadcast %cst_133 : f32 to vector<32x256xf32>
    %269 = arith.mulf %268, %267 : vector<32x256xf32>
    %cst_134 = arith.constant 0.707106769 : f32
    %270 = vector.broadcast %cst_134 : f32 to vector<32x256xf32>
    %271 = arith.mulf %267, %270 : vector<32x256xf32>
    %272 = math.absf %271 : vector<32x256xf32>
    %cst_135 = arith.constant 0.327591091 : f32
    %273 = vector.broadcast %cst_135 : f32 to vector<32x256xf32>
    %274 = arith.mulf %273, %272 : vector<32x256xf32>
    %cst_136 = arith.constant 1.000000e+00 : f32
    %275 = vector.broadcast %cst_136 : f32 to vector<32x256xf32>
    %276 = arith.addf %275, %274 : vector<32x256xf32>
    %cst_137 = arith.constant 1.000000e+00 : f32
    %277 = vector.broadcast %cst_137 : f32 to vector<32x256xf32>
    %278 = arith.divf %277, %276 : vector<32x256xf32>
    %cst_138 = arith.constant 1.06140542 : f32
    %279 = vector.broadcast %cst_138 : f32 to vector<32x256xf32>
    %280 = arith.mulf %279, %278 : vector<32x256xf32>
    %cst_139 = arith.constant -1.45315206 : f32
    %281 = vector.broadcast %cst_139 : f32 to vector<32x256xf32>
    %282 = arith.addf %280, %281 : vector<32x256xf32>
    %283 = arith.mulf %282, %278 : vector<32x256xf32>
    %cst_140 = arith.constant 1.42141378 : f32
    %284 = vector.broadcast %cst_140 : f32 to vector<32x256xf32>
    %285 = arith.addf %283, %284 : vector<32x256xf32>
    %286 = arith.mulf %285, %278 : vector<32x256xf32>
    %cst_141 = arith.constant -0.284496725 : f32
    %287 = vector.broadcast %cst_141 : f32 to vector<32x256xf32>
    %288 = arith.addf %286, %287 : vector<32x256xf32>
    %289 = arith.mulf %288, %278 : vector<32x256xf32>
    %cst_142 = arith.constant 0.254829586 : f32
    %290 = vector.broadcast %cst_142 : f32 to vector<32x256xf32>
    %291 = arith.addf %289, %290 : vector<32x256xf32>
    %292 = arith.mulf %291, %278 : vector<32x256xf32>
    %cst_143 = arith.constant 0.000000e+00 : f32
    %293 = vector.broadcast %cst_143 : f32 to vector<32x256xf32>
    %294 = arith.subf %293, %272 : vector<32x256xf32>
    %295 = arith.mulf %294, %272 : vector<32x256xf32>
    %296 = math.exp %295 : vector<32x256xf32>
    %297 = arith.mulf %292, %296 : vector<32x256xf32>
    %cst_144 = arith.constant 1.000000e+00 : f32
    %298 = vector.broadcast %cst_144 : f32 to vector<32x256xf32>
    %299 = arith.subf %298, %297 : vector<32x256xf32>
    %cst_145 = arith.constant 0.000000e+00 : f32
    %300 = vector.broadcast %cst_145 : f32 to vector<32x256xf32>
    %301 = arith.cmpf oge, %271, %300 : vector<32x256xf32>
    %cst_146 = arith.constant 0.000000e+00 : f32
    %302 = vector.broadcast %cst_146 : f32 to vector<32x256xf32>
    %303 = arith.subf %302, %299 : vector<32x256xf32>
    %304 = arith.select %301, %299, %303 : vector<32x256xi1>, vector<32x256xf32>
    %cst_147 = arith.constant 1.000000e+00 : f32
    %305 = vector.broadcast %cst_147 : f32 to vector<32x256xf32>
    %306 = arith.addf %305, %304 : vector<32x256xf32>
    %307 = arith.mulf %269, %306 : vector<32x256xf32>
    %c0_148 = arith.constant 0 : index
    %c0_149 = arith.constant 0 : index
    %308 = vector.load %arg11[%c0_148, %c0_149] : memref<8x32xf32, #tpu.memory_space<vmem>>, vector<8x32xf32>
    %cst_150 = arith.constant dense<0.000000e+00> : vector<8x256xf32>
    %309 = tpu.matmul %308, %307, %cst_150 {dimension_numbers = #tpu.dot_dimension_numbers<[1], [0], [0], [1], [0, 0, 1, 1], [], []>} : vector<8x32xf32>, vector<32x256xf32>, vector<8x256xf32> -> vector<8x256xf32>
    %c0_151 = arith.constant 0 : index
    %c0_152 = arith.constant 0 : index
    %310 = vector.load %arg12[%c0_151, %c0_152] : memref<8x1xf32, #tpu.memory_space<vmem>>, vector<8x1xf32>
    %311 = vector.broadcast %310 : vector<8x1xf32> to vector<8x256xf32>
    %312 = arith.addf %309, %311 : vector<8x256xf32>
    %313 = arith.addf %312, %179 : vector<8x256xf32>
    %c1_153 = arith.constant 1 : index
    %c0_154 = arith.constant 0 : index
    %c0_155 = arith.constant 0 : index
    %314 = vector.load %arg13[%c1_153, %c0_154, %c0_155] : memref<2x8x256xf32, #tpu.memory_space<vmem>>, vector<1x8x256xf32>
    %315 = vector.shape_cast %314 : vector<1x8x256xf32> to vector<8x256xf32>
    %316 = vector.shape_cast %313 : vector<8x256xf32> to vector<1x8x256xf32>
    tpu.vector_store %arg13[%c1_153, %c0_154, %c0_155], %316 {strides = array<i32>} : memref<2x8x256xf32, #tpu.memory_space<vmem>>, vector<1x8x256xf32>,
    return
  }
}

</mosaic_0001>

<bundles_post_ra>
// kernel: simple_scala_block.1
= control target key start
LH: loop header
LB: loop body
LE: loop exit
PB: predicated region body
PF: predicated region fallthrough
CT: control target
= control target key end

     0   :  { %v1668_v12 = vmov 0   ;;  %v88_v40 = vlaneseq  ;;  %s1670_s19 = smov 16   ;;  %s1671_s20 = smov 15   ;;  %vm389_vm8 = vcmask 64512   ;;  %s2373_s0 = inlined_call_operand.vmem [shape: f32[2,8,256], index: 0, kind: input, shape index: {}]   ;;  %s2374_s2 = inlined_call_operand.vmem [shape: f32[9,8,1], index: 2, kind: input, shape index: {}]   ;;  %s2375_s5 = inlined_call_operand.vmem [shape: f32[8,1], index: 5, kind: input, shape index: {}]   ;;  %s2376_s6 = inlined_call_operand.vmem [shape: f32[8,1], index: 6, kind: input, shape index: {}]   ;;  %s2377_s1 = inlined_call_operand.vmem [shape: f32[9,1,256], index: 1, kind: input, shape index: {}]   ;;  %s2378_s4 = inlined_call_operand.vmem [shape: f32[8,1], index: 4, kind: input, shape index: {}]   ;;  %s2379_s3 = inlined_call_operand.vmem [shape: f32[8,8], index: 3, kind: input, shape index: {}]   ;;  %s2380_s7 = inlined_call_operand.vmem [shape: f32[8,1], index: 7, kind: input, shape index: {}]   ;;  %s2381_s8 = inlined_call_operand.vmem [shape: f32[8,1], index: 8, kind: input, shape index: {}]   ;;  %s2382_s10 = inlined_call_operand.vmem [shape: f32[32,1], index: 10, kind: input, shape index: {}]   ;;  %s2383_s12 = inlined_call_operand.vmem [shape: f32[8,1], index: 12, kind: input, shape index: {}]   ;;  %s2384_s9 = inlined_call_operand.vmem [shape: f32[32,8], index: 9, kind: input, shape index: {}]   ;;  %s2385_s11 = inlined_call_operand.vmem [shape: f32[8,32], index: 11, kind: input, shape index: {}]   ;;  %s2386_s13 = inlined_call_operand.vmem [shape: f32[2,8,256], index: 13, kind: output, shape index: {}]  }
   0x1   :  { %v1751_v0 = vld [vmem:[%s2373_s0] sm:$0xff]  ;;  %v1756_v1 = vld [vmem:[%s2373_s0 + $0x8] sm:$0xff]  ;;  %v1761_v2 = vld [vmem:[%s2373_s0 + $0x10] sm:$0xff]  ;;  %1599 = vset.pattern.permute.xlu1 %v1668_v12  ;;  %1598 = vset.pattern.permute.xlu0 %v1668_v12  ;;  %s1672_s21 = smov 1   ;;  %s1673_s22 = smov 127  }
   0x2   :  { %v46_v3 = vadd.f32 %v1756_v1, %v1751_v0  ;;  %v50_v4 = vmul.f32 %v1751_v0, %v1751_v0  ;;  %v51_v5 = vmul.f32 %v1756_v1, %v1756_v1  ;;  %v1772_v6 = vld [vmem:[%s2373_s0 + $0x18] sm:$0xff]  ;;  %v63_v7 = vmul.f32 %v1761_v2, %v1761_v2  ;;  %v80_v13 = vld [vmem:[%s2374_s2] sm:$0xff]  ;;  %v1542_v15 = vld [vmem:[%s2374_s2 + $0x8] sm:$0xff]  ;;  %s1674_s23 = smov 113   ;;  %s1675_s24 = smov 112  }
   0x3   :  { %v64_v8 = vmul.f32 %v1772_v6, %v1772_v6  ;;  %v59_v10 = vadd.f32 %v1772_v6, %v1761_v2  ;;  %v1548_v14 = vld [vmem:[%s2374_s2 + $0x20] sm:$0xff]  ;;  %v1554_v32 = vld [vmem:[%s2374_s2 + $0x38] sm:$0xff]  ;;  %v1544_v34 = vld [vmem:[%s2374_s2 + $0x10] sm:$0xff]  ;;  %v89_v41 = vshrl.u32 %v88_v40, 7  ;;  %s1677_s25 = smov 111   ;;  %v1854_v12 = vand.u32 127, %v88_v40 }
   0x4   :  { %47 = vadd.xlane.f32.xlu0 %v46_v3  ;;  %v52_v9 = vadd.f32 %v51_v5, %v50_v4  ;;  %v69_v27 = vld [vmem:[%s2375_s5] sm:$0xff]  ;;  %v1546_v35 = vld [vmem:[%s2374_s2 + $0x18] sm:$0xff]  ;;  %v1550_v36 = vld [vmem:[%s2374_s2 + $0x28] sm:$0xff]  ;;  %v1676_v4 = vmov 0.0  }
   0x5   :  { %v65_v11 = vadd.f32 %v64_v8, %v63_v7  ;;  %v70_v30 = vld [vmem:[%s2376_s6] sm:$0xff]  ;;  %v1552_v37 = vld [vmem:[%s2374_s2 + $0x30] sm:$0xff]  ;;  %v1816_v43 = vsub.s32 0, %v89_v41  ;;  %v1818_v44 = vsub.s32 1, %v89_v41  ;;  %v1549_v45 = vld [vmem:[%s2377_s1 + $0x8] sm:$0x3]  ;;  %457 = vmatprep.mubr.f32.mxu0 %v1676_v4  ;;  %626 = vmatprep.mubr.f32.mxu1 %v1676_v4 }
   0x6   :  { %53 = vadd.xlane.f32.xlu1 %v52_v9  ;;  %v1556_v38 = vld [vmem:[%s2374_s2 + $0x40] sm:$0xff]  ;;  %s1669_s2 = smov 17   ;;  %vm298_vm0 = vcmp.lt.s32.totalorder %v1854_v12, 17  ;;  %vm309_vm1 = vcmp.lt.s32.totalorder %v1854_v12, 16  ;;  %vm320_vm2 = vcmp.lt.s32.totalorder %v1854_v12, 15  ;;  %vm331_vm3 = vcmp.lt.s32.totalorder %v1854_v12, 1 }
   0x7   :  { %v179_v48 = vrot.slane %v1549_v45, %v1816_v43  ;;  %v183_v49 = vrot.slane %v1549_v45, %v1818_v44  ;;  %v383_v5 = vld [vmem:[%s2378_s4] sm:$0xff]  ;;  %vm342_vm4 = vcmp.lt.s32.totalorder %v1854_v12, 127  ;;  %vm353_vm5 = vcmp.lt.s32.totalorder %v1854_v12, 113 }
   0x8   :  { %60 = vadd.xlane.f32.xlu0 %v59_v10  ;;  %v1545_v40 = vld [vmem:[%s2377_s1 + $0x4] sm:$0x3]  ;;  %vm364_vm6 = vcmp.lt.s32.totalorder %v1854_v12, 112  ;;  %vm375_vm7 = vcmp.lt.s32.totalorder %v1854_v12, 111 }
   0xa   :  { %66 = vadd.xlane.f32.xlu1 %v65_v11  ;;  %v81_v11 = vld [vmem:[%s2377_s1] sm:$0x3] }
  0x1b   :  { %84 = vperm.xlu1 %1599, %v80_v13   ;;  %v91_v13 = vrot.slane %v81_v11, %v1816_v43 }
  0x1f   :  { %172 = vperm.xlu1 %1599, %v1548_v14   ;;  %v95_v14 = vrot.slane %v81_v11, %v1818_v44 }
  0x23   :  { %106 = vperm.xlu1 %1599, %v1542_v15  }
  0x91   :  { %v48_v16 = vpop.xlane.xlu0 %47 }
  0x93   :  { %v54_v17 = vpop.xlane.xlu1 %53 }
  0x95   :  { %v61_v18 = vpop.xlane.xlu0 %60 }
  0x96   :  { %v62_v19 = vadd.f32 %v61_v18, %v48_v16 }
  0x97   :  { %v67_v20 = vpop.xlane.xlu1 %66 }
  0x98   :  { %v71_v21 = vmul.f32 0.001953125, %v62_v19  ;;  %v68_v22 = vadd.f32 %v67_v20, %v54_v17 }
  0x9a   :  { %v73_v23 = vmul.f32 %v71_v21, %v71_v21  ;;  %v72_v24 = vmul.f32 0.001953125, %v68_v22 }
  0x9b   :  { %v1813_v39 = vpop.permute.xlu1 %84 }
  0x9c   :  { %v74_v25 = vsub.f32 %v72_v24, %v73_v23  ;;  %v98_v17 = vmul.f32 %v91_v13, %v1813_v39  ;;  %v99_v18 = vmul.f32 %v95_v14, %v1813_v39 }
  0x9e   :  { %v75_v26 = vadd.f32 1e-05, %v74_v25  ;;  %v1543_v25 = vld [vmem:[%s2377_s1 + $0x2] sm:$0x3] }
  0x9f   :  { %v173_v42 = vpop.permute.xlu1 %172 }
  0xa0   :  { %1600 = vrsqrt.f32 %v75_v26  ;;  %v186_v55 = vmul.f32 %v179_v48, %v173_v42  ;;  %v187_v56 = vmul.f32 %v183_v49, %v173_v42  ;;  %v135_v48 = vrot.slane %v1545_v40, %v1816_v43 }
  0xa1   :  { %v139_v49 = vrot.slane %v1545_v40, %v1818_v44 }
  0xa3   :  { %v1823_v46 = vpop.permute.xlu1 %106 }
  0xaa   :  { %v1601_v28 = vpop.eup %1600 }
  0xab   :  { %v77_v29 = vmul.f32 %v1601_v28, %v69_v27 }
  0xad   :  { %278 = vperm.xlu0 %1598, %v77_v29   ;;  %v78_v31 = vmul.f32 %v77_v29, %v71_v21 }
  0xaf   :  { %v79_v33 = vsub.f32 %v70_v30, %v78_v31 }
  0xb1   :  { %238 = vperm.xlu0 %1598, %v1554_v32   ;;  %285 = vperm.xlu1 %1599, %v79_v33  }
  0xb5   :  { %128 = vperm.xlu1 %1599, %v1544_v34   ;;  %v113_v34 = vrot.slane %v1543_v25, %v1816_v43 }
  0xb7   :  { %v120_v45 = vmul.f32 %v113_v34, %v1823_v46 }
  0xb9   :  { %150 = vperm.xlu1 %1599, %v1546_v35   ;;  %v117_v35 = vrot.slane %v1543_v25, %v1818_v44 }
  0xbd   :  { %194 = vperm.xlu1 %1599, %v1550_v36  }
  0xc1   :  { %216 = vperm.xlu1 %1599, %v1552_v37  }
  0xc5   :  { %260 = vperm.xlu1 %1599, %v1556_v38  }
 0x12c   :  { %v279_v47 = vpop.permute.xlu0 %278 }
 0x12d   :  { %v281_v50 = vmul.f32 %v279_v47, %v1751_v0  ;;  %v282_v51 = vmul.f32 %v279_v47, %v1756_v1  ;;  %v476_v52 = vmul.f32 %v1761_v2, %v279_v47  ;;  %v477_v53 = vmul.f32 %v1772_v6, %v279_v47 }
 0x12e   :  { %v121_v47 = vmul.f32 %v117_v35, %v1823_v46 }
 0x130   :  { %v286_v54 = vpop.permute.xlu1 %285  ;;  %v1858_v15 = vpop.permute.xlu0 %238 }
 0x131   :  { %v288_v57 = vadd.f32 %v286_v54, %v281_v50  ;;  %v289_v58 = vadd.f32 %v286_v54, %v282_v51  ;;  %v478_v59 = vadd.f32 %v476_v52, %v286_v54  ;;  %v479_v60 = vadd.f32 %v477_v53, %v286_v54 }
 0x133   :  { %294 = vrot.lane.b32.xlu0 %v289_v58, %s1669_s2  ;;  %292 = vrot.lane.b32.xlu1 %v288_v57, %s1669_s2  ;;  %v1831_v61 = vmul.f32 %v288_v57, %v186_v55  ;;  %v1833_v62 = vmul.f32 %v289_v58, %v187_v56  ;;  %v1835_v63 = vmul.f32 %v478_v59, %v186_v55 }
 0x134   :  { %v1837_v3 = vmul.f32 %v479_v60, %v187_v56  ;;  %v129_v7 = vpop.permute.xlu1 %128 }
 0x135   :  { %v142_v56 = vmul.f32 %v135_v48, %v129_v7 }
 0x137   :  { %484 = vrot.lane.b32.xlu0 %v479_v60, %s1669_s2  ;;  %482 = vrot.lane.b32.xlu1 %v478_v59, %s1669_s2 }
 0x138   :  { %v1844_v8 = vpop.permute.xlu1 %150 }
 0x13b   :  { %305 = vrot.lane.b32.xlu0 %v288_v57, %s1670_s19  ;;  %307 = vrot.lane.b32.xlu1 %v289_v58, %s1670_s19 }
 0x13c   :  { %v1846_v9 = vpop.permute.xlu1 %194 }
 0x13f   :  { %492 = vrot.lane.b32.xlu0 %v478_v59, %s1670_s19  ;;  %494 = vrot.lane.b32.xlu1 %v479_v60, %s1670_s19 }
 0x140   :  { %v1848_v10 = vpop.permute.xlu1 %216 }
 0x143   :  { %318 = vrot.lane.b32.xlu0 %v289_v58, %s1671_s20  ;;  %316 = vrot.lane.b32.xlu1 %v288_v57, %s1671_s20 }
 0x144   :  { %v1860_v16 = vpop.permute.xlu1 %260 }
 0x147   :  { %504 = vrot.lane.b32.xlu0 %v479_v60, %s1671_s20  ;;  %502 = vrot.lane.b32.xlu1 %v478_v59, %s1671_s20 }
 0x14b   :  { %327 = vrot.lane.b32.xlu0 %v288_v57, %s1672_s21  ;;  %329 = vrot.lane.b32.xlu1 %v289_v58, %s1672_s21 }
 0x14f   :  { %512 = vrot.lane.b32.xlu0 %v478_v59, %s1672_s21  ;;  %514 = vrot.lane.b32.xlu1 %v479_v60, %s1672_s21 }
 0x153   :  { %338 = vrot.lane.b32.xlu0 %v288_v57, %s1673_s22  ;;  %340 = vrot.lane.b32.xlu1 %v289_v58, %s1673_s22 }
 0x157   :  { %522 = vrot.lane.b32.xlu0 %v478_v59, %s1673_s22  ;;  %524 = vrot.lane.b32.xlu1 %v479_v60, %s1673_s22 }
 0x15b   :  { %349 = vrot.lane.b32.xlu0 %v288_v57, %s1674_s23  ;;  %351 = vrot.lane.b32.xlu1 %v289_v58, %s1674_s23 }
 0x15f   :  { %532 = vrot.lane.b32.xlu0 %v478_v59, %s1674_s23  ;;  %534 = vrot.lane.b32.xlu1 %v479_v60, %s1674_s23 }
 0x163   :  { %360 = vrot.lane.b32.xlu0 %v288_v57, %s1675_s24  ;;  %362 = vrot.lane.b32.xlu1 %v289_v58, %s1675_s24 }
 0x167   :  { %542 = vrot.lane.b32.xlu0 %v478_v59, %s1675_s24  ;;  %544 = vrot.lane.b32.xlu1 %v479_v60, %s1675_s24 }
 0x16b   :  { %371 = vrot.lane.b32.xlu0 %v288_v57, %s1677_s25  ;;  %373 = vrot.lane.b32.xlu1 %v289_v58, %s1677_s25  ;;  %v143_v57 = vmul.f32 %v139_v49, %v129_v7 }
 0x16f   :  { %552 = vrot.lane.b32.xlu0 %v478_v59, %s1677_s25  ;;  %554 = vrot.lane.b32.xlu1 %v479_v60, %s1677_s25  ;;  %v1547_v59 = vld [vmem:[%s2377_s1 + $0x6] sm:$0x3] }
 0x170   :  { %v157_v7 = vrot.slane %v1547_v59, %v1816_v43 }
 0x173   :  { %386 = vperm.xlu0 %1598, %v383_v5  }
 0x1a5   :  { %v295_v19 = vpop.permute.xlu0 %294  ;;  %v293_v20 = vpop.permute.xlu1 %292 }
 0x1a6   :  { %v299_v21 = vsel %vm298_vm0, %v293_v20, %v295_v19  ;;  %v300_v22 = vsel %vm298_vm0, %v295_v19, %v293_v20 }
 0x1a7   :  { %v301_v23 = vmul.f32 %v300_v22, %v98_v17  ;;  %v302_v24 = vmul.f32 %v299_v21, %v99_v18 }
 0x1a9   :  { %v303_v26 = vadd.f32 %v301_v23, %v1831_v61  ;;  %v304_v27 = vadd.f32 %v302_v24, %v1833_v62  ;;  %v485_v28 = vpop.permute.xlu0 %484  ;;  %v483_v29 = vpop.permute.xlu1 %482 }
 0x1aa   :  { %v486_v30 = vsel %vm298_vm0, %v483_v29, %v485_v28  ;;  %v487_v31 = vsel %vm298_vm0, %v485_v28, %v483_v29 }
 0x1ab   :  { %v488_v32 = vmul.f32 %v487_v31, %v98_v17  ;;  %v489_v33 = vmul.f32 %v486_v30, %v99_v18 }
 0x1ad   :  { %v490_v36 = vadd.f32 %v488_v32, %v1835_v63  ;;  %v491_v37 = vadd.f32 %v489_v33, %v1837_v3  ;;  %v306_v38 = vpop.permute.xlu0 %305  ;;  %v308_v39 = vpop.permute.xlu1 %307 }
 0x1ae   :  { %v310_v41 = vsel %vm309_vm1, %v306_v38, %v308_v39  ;;  %v311_v42 = vsel %vm309_vm1, %v308_v39, %v306_v38 }
 0x1af   :  { %v312_v52 = vmul.f32 %v311_v42, %v120_v45  ;;  %v313_v53 = vmul.f32 %v310_v41, %v121_v47 }
 0x1b1   :  { %v493_v50 = vpop.permute.xlu0 %492  ;;  %v495_v51 = vpop.permute.xlu1 %494  ;;  %v314_v60 = vadd.f32 %v312_v52, %v303_v26  ;;  %v315_v61 = vadd.f32 %v313_v53, %v304_v27  ;;  %v164_v26 = vmul.f32 %v157_v7, %v1844_v8 }
 0x1b2   :  { %v496_v54 = vsel %vm309_vm1, %v493_v50, %v495_v51  ;;  %v497_v55 = vsel %vm309_vm1, %v495_v51, %v493_v50  ;;  %v1555_v50 = vld [vmem:[%s2377_s1 + $0xe] sm:$0x3]  ;;  %v1553_v51 = vld [vmem:[%s2377_s1 + $0xc] sm:$0x3]  ;;  %vm1022_vm1 = vcmask 261120  }
 0x1b3   :  { %v498_v3 = vmul.f32 %v497_v55, %v120_v45  ;;  %v499_v5 = vmul.f32 %v496_v54, %v121_v47  ;;  %v1551_v45 = vld [vmem:[%s2377_s1 + $0xa] sm:$0x3]  ;;  %v161_v47 = vrot.slane %v1547_v59, %v1818_v44  ;;  %v245_v55 = vrot.slane %v1555_v50, %v1816_v43 }
 0x1b4   :  { %v201_v52 = vrot.slane %v1551_v45, %v1816_v43  ;;  %v205_v53 = vrot.slane %v1551_v45, %v1818_v44 }
 0x1b5   :  { %v319_v58 = vpop.permute.xlu0 %318  ;;  %v317_v46 = vpop.permute.xlu1 %316  ;;  %v500_v22 = vadd.f32 %v498_v3, %v490_v36  ;;  %v501_v23 = vadd.f32 %v499_v5, %v491_v37 }
 0x1b6   :  { %v321_v62 = vsel %vm320_vm2, %v317_v46, %v319_v58  ;;  %v322_v63 = vsel %vm320_vm2, %v319_v58, %v317_v46  ;;  %v1557_v58 = vld [vmem:[%s2377_s1 + $0x10] sm:$0x3]  ;;  %v209_v3 = vmul.f32 %v205_v53, %v1846_v9 }
 0x1b7   :  { %v323_v11 = vmul.f32 %v322_v63, %v142_v56  ;;  %v324_v13 = vmul.f32 %v321_v62, %v143_v57  ;;  %v208_v63 = vmul.f32 %v201_v52, %v1846_v9 }
 0x1b9   :  { %v325_v14 = vadd.f32 %v323_v11, %v314_v60  ;;  %v1899_v17 = vadd.f32 %v324_v13, %v315_v61  ;;  %v505_v18 = vpop.permute.xlu0 %504  ;;  %v503_v19 = vpop.permute.xlu1 %502  ;;  %v227_v60 = vrot.slane %v1553_v51, %v1818_v44  ;;  %v267_v11 = vrot.slane %v1557_v58, %v1816_v43 }
 0x1ba   :  { %v506_v20 = vsel %vm320_vm2, %v503_v19, %v505_v18  ;;  %v507_v21 = vsel %vm320_vm2, %v505_v18, %v503_v19  ;;  %v271_v13 = vrot.slane %v1557_v58, %v1818_v44 }
 0x1bb   :  { %v508_v24 = vmul.f32 %v507_v21, %v142_v56  ;;  %v509_v25 = vmul.f32 %v506_v20, %v143_v57  ;;  %v165_v56 = vmul.f32 %v161_v47, %v1844_v8  ;;  %v223_v57 = vrot.slane %v1553_v51, %v1816_v43 }
 0x1bc   :  { %v249_v8 = vrot.slane %v1555_v50, %v1818_v44  ;;  %v231_v43 = vmul.f32 %v227_v60, %v1848_v10  ;;  %v274_v45 = vmul.f32 %v267_v11, %v1860_v16 }
 0x1bd   :  { %v510_v27 = vadd.f32 %v508_v24, %v500_v22  ;;  %v1907_v28 = vadd.f32 %v509_v25, %v501_v23  ;;  %v328_v29 = vpop.permute.xlu0 %327  ;;  %v330_v30 = vpop.permute.xlu1 %329  ;;  %v230_v22 = vmul.f32 %v223_v57, %v1848_v10 }
 0x1be   :  { %v333_v31 = vsel %vm331_vm3, %v330_v30, %v328_v29  ;;  %v332_v54 = vsel %vm331_vm3, %v328_v29, %v330_v30  ;;  %v252_v29 = vmul.f32 %v245_v55, %v1858_v15  ;;  %v253_v30 = vmul.f32 %v249_v8, %v1858_v15 }
 0x1bf   :  { %v334_v32 = vmul.f32 %v333_v31, %v164_v26  ;;  %v335_v5 = vmul.f32 %v332_v54, %v165_v56  ;;  %v275_v15 = vmul.f32 %v271_v13, %v1860_v16 }
 0x1c1   :  { %v336_v33 = vadd.f32 %v334_v32, %v325_v14  ;;  %v513_v34 = vpop.permute.xlu0 %512  ;;  %v515_v35 = vpop.permute.xlu1 %514  ;;  %v337_v24 = vadd.f32 %v335_v5, %v1899_v17 }
 0x1c2   :  { %v517_v36 = vsel %vm331_vm3, %v515_v35, %v513_v34  ;;  %v516_v7 = vsel %vm331_vm3, %v513_v34, %v515_v35 }
 0x1c3   :  { %v518_v37 = vmul.f32 %v517_v36, %v164_v26  ;;  %v519_v25 = vmul.f32 %v516_v7, %v165_v56  ;;  %v382_v7 = vld [vmem:[%s2379_s3] sm:$0xff] }
 0x1c5   :  { %v1913_v38 = vadd.f32 %v518_v37, %v510_v27  ;;  %v339_v39 = vpop.permute.xlu0 %338  ;;  %v341_v40 = vpop.permute.xlu1 %340  ;;  %v521_v47 = vadd.f32 %v519_v25, %v1907_v28 }
 0x1c6   :  { %v343_v61 = vsel %vm342_vm4, %v339_v39, %v341_v40  ;;  %v344_v62 = vsel %vm342_vm4, %v341_v40, %v339_v39 }
 0x1c7   :  { %v345_v14 = vmul.f32 %v343_v61, %v208_v63  ;;  %v346_v18 = vmul.f32 %v344_v62, %v209_v3 }
 0x1c9   :  { %v523_v41 = vpop.permute.xlu0 %522  ;;  %v525_v42 = vpop.permute.xlu1 %524  ;;  %v347_v32 = vadd.f32 %v345_v14, %v336_v33  ;;  %v348_v34 = vadd.f32 %v346_v18, %v337_v24 }
 0x1ca   :  { %v526_v44 = vsel %vm342_vm4, %v523_v41, %v525_v42  ;;  %v527_v23 = vsel %vm342_vm4, %v525_v42, %v523_v41 }
 0x1cb   :  { %v528_v35 = vmul.f32 %v526_v44, %v208_v63  ;;  %v529_v36 = vmul.f32 %v527_v23, %v209_v3 }
 0x1cd   :  { %v350_v48 = vpop.permute.xlu0 %349  ;;  %v352_v49 = vpop.permute.xlu1 %351  ;;  %v530_v51 = vadd.f32 %v528_v35, %v1913_v38  ;;  %v531_v52 = vadd.f32 %v529_v36, %v521_v47 }
 0x1ce   :  { %v354_v19 = vsel %vm353_vm5, %v350_v48, %v352_v49  ;;  %v355_v20 = vsel %vm353_vm5, %v352_v49, %v350_v48 }
 0x1cf   :  { %v356_v10 = vmul.f32 %v354_v19, %v230_v22  ;;  %v357_v31 = vmul.f32 %v355_v20, %v231_v43 }
 0x1d1   :  { %v533_v46 = vpop.permute.xlu0 %532  ;;  %v535_v59 = vpop.permute.xlu1 %534  ;;  %v358_v33 = vadd.f32 %v356_v10, %v347_v32  ;;  %v359_v50 = vadd.f32 %v357_v31, %v348_v34 }
 0x1d2   :  { %v536_v17 = vsel %vm353_vm5, %v533_v46, %v535_v59  ;;  %v537_v40 = vsel %vm353_vm5, %v535_v59, %v533_v46 }
 0x1d3   :  { %v538_v53 = vmul.f32 %v536_v17, %v230_v22  ;;  %v539_v54 = vmul.f32 %v537_v40, %v231_v43 }
 0x1d5   :  { %v361_v21 = vpop.permute.xlu0 %360  ;;  %v363_v9 = vpop.permute.xlu1 %362  ;;  %v540_v62 = vadd.f32 %v538_v53, %v530_v51  ;;  %v541_v5 = vadd.f32 %v539_v54, %v531_v52  ;;  %v646_v52 = vld [vmem:[%s2381_s8] sm:$0xff]  ;;  %v675_v54 = vld [vmem:[%s2382_s10 + $0x8] sm:$0xff] }
 0x1d6   :  { %v365_v26 = vsel %vm364_vm6, %v361_v21, %v363_v9  ;;  %v366_v27 = vsel %vm364_vm6, %v363_v9, %v361_v21 }
 0x1d7   :  { %v367_v41 = vmul.f32 %v365_v26, %v252_v29  ;;  %v368_v42 = vmul.f32 %v366_v27, %v253_v30 }
 0x1d9   :  { %v543_v37 = vpop.permute.xlu0 %542  ;;  %v545_v39 = vpop.permute.xlu1 %544  ;;  %v370_v57 = vadd.f32 %v368_v42, %v359_v50  ;;  %v369_v58 = vadd.f32 %v367_v41, %v358_v33 }
 0x1da   :  { %v546_v48 = vsel %vm364_vm6, %v543_v37, %v545_v39  ;;  %v547_v49 = vsel %vm364_vm6, %v545_v39, %v543_v37 }
 0x1db   :  { %v548_v46 = vmul.f32 %v546_v48, %v252_v29  ;;  %v549_v59 = vmul.f32 %v547_v49, %v253_v30  ;;  %v645_v49 = vld [vmem:[%s2380_s7] sm:$0xff] }
 0x1dd   :  { %v372_v55 = vpop.permute.xlu0 %371  ;;  %v374_v56 = vpop.permute.xlu1 %373  ;;  %v551_v18 = vadd.f32 %v549_v59, %v541_v5  ;;  %v550_v20 = vadd.f32 %v548_v46, %v540_v62  ;;  %v2051_v5 = vld [vmem:[%s2384_s9] sm:$0xff] }
 0x1de   :  { %v376_v16 = vsel %vm375_vm7, %v372_v55, %v374_v56  ;;  %v377_v28 = vsel %vm375_vm7, %v374_v56, %v372_v55  ;;  %v677_v56 = vld [vmem:[%s2382_s10 + $0x18] sm:$0xff] }
 0x1df   :  { %v378_v60 = vmul.f32 %v376_v16, %v274_v45  ;;  %v379_v61 = vmul.f32 %v377_v28, %v275_v15  ;;  %v674_v16 = vld [vmem:[%s2382_s10] sm:$0xff]  ;;  %v676_v28 = vld [vmem:[%s2382_s10 + $0x10] sm:$0xff] }
 0x1e1   :  { %v553_v8 = vpop.permute.xlu0 %552  ;;  %v555_v38 = vpop.permute.xlu1 %554  ;;  %v381_v63 = vadd.f32 %v379_v61, %v370_v57  ;;  %v380_v3 = vadd.f32 %v378_v60, %v369_v58  ;;  %v1451_v57 = vld [vmem:[%s2383_s12] sm:$0xff] }
 0x1e2   :  { %v556_v11 = vsel %vm375_vm7, %v553_v8, %v555_v38  ;;  %v557_v13 = vsel %vm375_vm7, %v555_v38, %v553_v8 }
 0x1e3   :  { %v558_v14 = vmul.f32 %v556_v11, %v274_v45  ;;  %393 = vmatprep.subr.mxu0 %v381_v63  ;;  %v559_v19 = vmul.f32 %v557_v13, %v275_v15  ;;  %v2059_v11 = vld [vmem:[%s2384_s9 + $0x8] sm:$0xff]  ;;  %v2067_v13 = vld [vmem:[%s2384_s9 + $0x10] sm:$0xff] }
 0x1e4   :  { %394 = vmatpush1.msra.mxu0 %v380_v3 }
 0x1e5   :  { %1558 = vmatmul.mubr.msk.f32.vlgmr.msra.gmra.mrb[0].mxu0 %vm389_vm8, %v382_v7  ;;  %v561_v21 = vadd.f32 %v559_v19, %v551_v18  ;;  %v560_v9 = vadd.f32 %v558_v14, %v550_v20 }
 0x1e6   :  { %774 = vmatprep.mubr.f32.mxu0 %v1676_v4 }
 0x1e7   :  { %562 = vmatprep.subr.mxu1 %v561_v21 }
 0x1e8   :  { %563 = vmatpush1.msra.mxu1 %v560_v9 }
 0x1e9   :  { %1559 = vmatmul.mubr.msk.f32.vlgmr.msra.gmra.mrb[0].mxu1 %vm389_vm8, %v382_v7  ;;  %v2075_v7 = vld [vmem:[%s2384_s9 + $0x18] sm:$0xff] }
 0x1ea   :  { %1090 = vmatprep.mubr.f32.mxu1 %v1676_v4 }
 0x1f2   :  { %v387_v12 = vpop.permute.xlu0 %386 }
 0x2b8   :  { %v459_v22 = vpop.f32.mrb[0].mxu0 }
 0x2b9   :  { %v460_v43 = vadd.f32 %v459_v22, %v387_v12  ;;  %v461_v44 = vpop.f32.mrb[1].mxu0 }
 0x2ba   :  { %v462_v23 = vadd.f32 %v461_v44, %v387_v12 }
 0x2bb   :  { %v1996_v24 = vadd.f32 %v460_v43, %v1751_v0 }
 0x2bc   :  { %v1999_v25 = vadd.f32 %v462_v23, %v1756_v1  ;;  %v628_v26 = vpop.f32.mrb[0].mxu1 }
 0x2bd   :  { %v629_v27 = vadd.f32 %v628_v26, %v387_v12  ;;  %v630_v29 = vpop.f32.mrb[1].mxu1  ;;  %v470_v35 = vmul.f32 %v1996_v24, %v1996_v24 }
 0x2be   :  { %v631_v30 = vadd.f32 %v630_v29, %v387_v12  ;;  %v466_v10 = vadd.f32 %v1999_v25, %v1996_v24 }
 0x2bf   :  { %v2004_v31 = vadd.f32 %v1761_v2, %v629_v27  ;;  %v471_v2 = vmul.f32 %v1999_v25, %v1999_v25 }
 0x2c0   :  { %v2007_v32 = vadd.f32 %v1772_v6, %v631_v30  ;;  %467 = vadd.xlane.f32.xlu1 %v466_v10 }
 0x2c1   :  { %v639_v0 = vmul.f32 %v2004_v31, %v2004_v31  ;;  %v472_v6 = vadd.f32 %v471_v2, %v470_v35 }
 0x2c2   :  { %v635_v1 = vadd.f32 %v2007_v32, %v2004_v31  ;;  %v640_v34 = vmul.f32 %v2007_v32, %v2007_v32 }
 0x2c4   :  { %636 = vadd.xlane.f32.xlu0 %v635_v1  ;;  %v641_v36 = vadd.f32 %v640_v34, %v639_v0 }
 0x2c6   :  { %642 = vadd.xlane.f32.xlu1 %v641_v36 }
 0x2c8   :  { %473 = vadd.xlane.f32.xlu0 %v472_v6 }
 0x34d   :  { %v468_v37 = vpop.xlane.xlu1 %467 }
 0x351   :  { %v637_v39 = vpop.xlane.xlu0 %636 }
 0x352   :  { %v638_v17 = vadd.f32 %v637_v39, %v468_v37 }
 0x353   :  { %v643_v41 = vpop.xlane.xlu1 %642 }
 0x354   :  { %v647_v40 = vmul.f32 0.001953125, %v638_v17 }
 0x355   :  { %v474_v42 = vpop.xlane.xlu0 %473 }
 0x356   :  { %v644_v45 = vadd.f32 %v643_v41, %v474_v42  ;;  %v649_v15 = vmul.f32 %v647_v40, %v647_v40 }
 0x358   :  { %v648_v47 = vmul.f32 0.001953125, %v644_v45 }
 0x35a   :  { %v650_v33 = vsub.f32 %v648_v47, %v649_v15 }
 0x35c   :  { %v651_v48 = vadd.f32 1e-05, %v650_v33 }
 0x35e   :  { %1602 = vrsqrt.f32 %v651_v48 }
 0x368   :  { %v1603_v50 = vpop.eup %1602 }
 0x369   :  { %v653_v51 = vmul.f32 %v1603_v50, %v645_v49 }
 0x36b   :  { %658 = vperm.xlu0 %1598, %v653_v51   ;;  %v654_v53 = vmul.f32 %v653_v51, %v647_v40 }
 0x36d   :  { %v655_v55 = vsub.f32 %v646_v52, %v654_v53 }
 0x36f   :  { %685 = vperm.xlu0 %1598, %v675_v54   ;;  %665 = vperm.xlu1 %1599, %v655_v55  }
 0x373   :  { %695 = vperm.xlu0 %1598, %v677_v56   ;;  %680 = vperm.xlu1 %1599, %v674_v16  }
 0x377   :  { %1120 = vperm.xlu0 %1598, %v675_v54   ;;  %690 = vperm.xlu1 %1599, %v676_v28  }
 0x37b   :  { %1130 = vperm.xlu0 %1598, %v677_v56   ;;  %1115 = vperm.xlu1 %1599, %v674_v16  }
 0x37f   :  { %1454 = vperm.xlu0 %1598, %v1451_v57   ;;  %1125 = vperm.xlu1 %1599, %v676_v28  }
 0x383   :  { %1019 = vperm.xlu1 %1599, %v1451_v57  }
 0x3ea   :  { %v659_v58 = vpop.permute.xlu0 %658 }
 0x3eb   :  { %v661_v46 = vmul.f32 %v659_v58, %v1996_v24  ;;  %v662_v59 = vmul.f32 %v659_v58, %v1999_v25  ;;  %v1101_v60 = vmul.f32 %v659_v58, %v2004_v31  ;;  %v1102_v61 = vmul.f32 %v659_v58, %v2007_v32 }
 0x3ee   :  { %v666_v62 = vpop.permute.xlu1 %665  ;;  %v686_v12 = vpop.permute.xlu0 %685 }
 0x3ef   :  { %v668_v8 = vadd.f32 %v666_v62, %v661_v46  ;;  %v2044_v38 = vadd.f32 %v1101_v60, %v666_v62  ;;  %v669_v63 = vadd.f32 %v666_v62, %v662_v59  ;;  %v2046_v3 = vadd.f32 %v1102_v61, %v666_v62 }
 0x3f1   :  { %710 = vmatprep.subr.mxu0 %v669_v63 }
 0x3f2   :  { %711 = vmatpush1.msra.mxu0 %v668_v8  ;;  %v681_v14 = vpop.permute.xlu1 %680  ;;  %v696_v52 = vpop.permute.xlu0 %695 }
 0x3f3   :  { %1560 = vmatmul.mubr.msk.f32.vlgmr.msra.gmra.mrb[2].mxu0 %vm389_vm8, %v2051_v5 }
 0x3f4   :  { %780 = vmatprep.mubr.f32.mxu0 %v1676_v4 }
 0x3f6   :  { %v691_v40 = vpop.permute.xlu1 %690 }
 0x3f7   :  { %1561 = vmatmul.mubr.msk.f32.gmra.mrb[4].mxu0 %vm389_vm8, %v2059_v11 }
 0x3f8   :  { %786 = vmatprep.mubr.f32.mxu0 %v1676_v4 }
 0x3fb   :  { %1562 = vmatmul.mubr.msk.f32.gmra.mrb[6].mxu0 %vm389_vm8, %v2067_v13 }
 0x3fc   :  { %792 = vmatprep.mubr.f32.mxu0 %v1676_v4 }
 0x3ff   :  { %1563 = vmatmul.mubr.msk.f32.gmra.mrb[8].mxu0 %vm389_vm8, %v2075_v7 }
 0x400   :  { %1524 = vmatprep.mubr.f32.mxu0 %v1676_v4 }
 0x4c6   :  { %v776_v18 = vpop.f32.mrb[2].mxu0 }
 0x4c7   :  { %v777_v19 = vadd.f32 %v776_v18, %v681_v14  ;;  %v778_v20 = vpop.f32.mrb[3].mxu0 }
 0x4c8   :  { %v779_v21 = vadd.f32 %v778_v20, %v681_v14 }
 0x4c9   :  { %v2080_v9 = vmul.f32 0.70710677, %v777_v19  ;;  %v2114_v58 = vmul.f32 0.5, %v777_v19 }
 0x4ca   :  { %v2082_v22 = vmul.f32 0.70710677, %v779_v21  ;;  %v782_v43 = vpop.f32.mrb[4].mxu0  ;;  %v2119_v61 = vmul.f32 0.5, %v779_v21 }
 0x4cb   :  { %v815_v44 = vand.u32 2147483647, %v2080_v9  ;;  %v2085_v23 = vadd.f32 %v782_v43, %v686_v12  ;;  %v784_v26 = vpop.f32.mrb[5].mxu0  ;;  %vm975_vm9 = vcmp.ge.f32.partialorder %v2080_v9, 0.0 }
 0x4cc   :  { %v816_v27 = vand.u32 2147483647, %v2082_v22  ;;  %v2088_v29 = vadd.f32 %v784_v26, %v686_v12  ;;  %vm976_vm10 = vcmp.ge.f32.partialorder %v2082_v22, 0.0 }
 0x4cd   :  { %v823_v30 = vmul.f32 0.3275911, %v815_v44  ;;  %v2091_v10 = vmul.f32 0.70710677, %v2085_v23  ;;  %v927_v35 = vsub.f32 0.0, %v815_v44 }
 0x4ce   :  { %v824_v0 = vmul.f32 0.3275911, %v816_v27  ;;  %v2094_v1 = vmul.f32 0.70710677, %v2088_v29  ;;  %v788_v36 = vpop.f32.mrb[6].mxu0  ;;  %v928_v50 = vsub.f32 0.0, %v816_v27 }
 0x4cf   :  { %v831_v34 = vadd.f32 1.0, %v823_v30  ;;  %v817_v2 = vand.u32 2147483647, %v2091_v10  ;;  %v790_v39 = vpop.f32.mrb[7].mxu0  ;;  %v935_v45 = vmul.f32 %v927_v35, %v815_v44  ;;  %v2098_v47 = vadd.f32 %v788_v36, %v691_v40 }
 0x4d0   :  { %v832_v6 = vadd.f32 1.0, %v824_v0  ;;  %v818_v37 = vand.u32 2147483647, %v2094_v1  ;;  %v2100_v49 = vadd.f32 %v790_v39, %v691_v40  ;;  %v936_v46 = vmul.f32 %v928_v50, %v816_v27 }
 0x4d1   :  { %1604 = vrcp.f32 %v831_v34  ;;  %v825_v17 = vmul.f32 0.3275911, %v817_v2  ;;  %v2103_v51 = vmul.f32 0.70710677, %v2098_v47  ;;  %v943_v54 = vmul.f32 1.442695, %v935_v45 }
 0x4d2   :  { %1606 = vrcp.f32 %v832_v6  ;;  %v826_v41 = vmul.f32 0.3275911, %v818_v37  ;;  %v794_v42 = vpop.f32.mrb[8].mxu0  ;;  %v2106_v53 = vmul.f32 0.70710677, %v2100_v49  ;;  %v929_v55 = vsub.f32 0.0, %v817_v2 }
 0x4d3   :  { %v833_v15 = vadd.f32 1.0, %v825_v17  ;;  %v796_v33 = vpop.f32.mrb[9].mxu0  ;;  %v819_v56 = vand.u32 2147483647, %v2103_v51  ;;  %v2109_v16 = vadd.f32 %v794_v42, %v696_v52  ;;  %v930_v62 = vsub.f32 0.0, %v818_v37 }
 0x4d4   :  { %v834_v48 = vadd.f32 1.0, %v826_v41  ;;  %v820_v28 = vand.u32 2147483647, %v2106_v53  ;;  %v2112_v57 = vadd.f32 %v796_v33, %v696_v52  ;;  %v937_v18 = vmul.f32 %v929_v55, %v817_v2 }
 0x4d5   :  { %1608 = vrcp.f32 %v833_v15  ;;  %v827_v59 = vmul.f32 0.3275911, %v819_v56  ;;  %v2117_v60 = vmul.f32 0.70710677, %v2109_v16  ;;  %v931_v44 = vsub.f32 0.0, %v819_v56 }
 0x4d6   :  { %1610 = vrcp.f32 %v834_v48  ;;  %v828_v8 = vmul.f32 0.3275911, %v820_v28  ;;  %v2122_v63 = vmul.f32 0.70710677, %v2112_v57  ;;  %v945_v30 = vmul.f32 1.442695, %v936_v46 }
 0x4d7   :  { %1612 = vpow2.f32 %v943_v54  ;;  %v835_v20 = vadd.f32 1.0, %v827_v59  ;;  %v821_v19 = vand.u32 2147483647, %v2117_v60  ;;  %v938_v35 = vmul.f32 %v930_v62, %v818_v37 }
 0x4d8   :  { %v836_v26 = vadd.f32 1.0, %v828_v8  ;;  %v822_v21 = vand.u32 2147483647, %v2122_v63  ;;  %v932_v2 = vsub.f32 0.0, %v820_v28  ;;  %v947_v15 = vmul.f32 1.442695, %v937_v18 }
 0x4d9   :  { %1614 = vrcp.f32 %v835_v20  ;;  %v829_v0 = vmul.f32 0.3275911, %v821_v19  ;;  %v933_v17 = vsub.f32 0.0, %v821_v19  ;;  %v939_v33 = vmul.f32 %v931_v44, %v819_v56 }
 0x4da   :  { %1616 = vrcp.f32 %v836_v26  ;;  %v830_v40 = vmul.f32 0.3275911, %v822_v21  ;;  %v949_v55 = vmul.f32 1.442695, %v938_v35  ;;  %v940_v46 = vmul.f32 %v932_v2, %v820_v28 }
 0x4db   :  { %v2124_v14 = vpop.eup %1604  ;;  %v837_v39 = vadd.f32 1.0, %v829_v0  ;;  %v941_v8 = vmul.f32 %v933_v17, %v821_v19  ;;  %v951_v56 = vmul.f32 1.442695, %v939_v33  ;;  %v2144_v26 = vmul.f32 0.5, %v2085_v23 }
 0x4dc   :  { %v2127_v12 = vpop.eup %1606  ;;  %v855_v43 = vmul.f32 1.0614054, %v2124_v14  ;;  %v838_v50 = vadd.f32 1.0, %v830_v40  ;;  %v934_v0 = vsub.f32 0.0, %v822_v21  ;;  %v953_v19 = vmul.f32 1.442695, %v940_v46 }
 0x4dd   :  { %v856_v27 = vmul.f32 1.0614054, %v2127_v12  ;;  %1618 = vrcp.f32 %v837_v39  ;;  %vm977_vm11 = vcmp.ge.f32.partialorder %v2091_v10, 0.0  ;;  %vm978_vm12 = vcmp.ge.f32.partialorder %v2094_v1, 0.0 }
 0x4de   :  { %v863_v34 = vadd.f32 -1.4531521, %v855_v43  ;;  %1620 = vrcp.f32 %v838_v50  ;;  %v942_v33 = vmul.f32 %v934_v0, %v822_v21  ;;  %vm979_vm13 = vcmp.ge.f32.partialorder %v2103_v51, 0.0 }
 0x4df   :  { %v2132_v36 = vpop.eup %1608  ;;  %v864_v6 = vadd.f32 -1.4531521, %v856_v27  ;;  %1622 = vpow2.f32 %v945_v30  ;;  %vm981_vm14 = vcmp.ge.f32.partialorder %v2117_v60, 0.0  ;;  %vm980_vm15 = vcmp.ge.f32.partialorder %v2106_v53, 0.0 }
 0x4e0   :  { %v2134_v41 = vpop.eup %1610  ;;  %v871_v42 = vmul.f32 %v2124_v14, %v863_v34  ;;  %v857_v45 = vmul.f32 1.0614054, %v2132_v36  ;;  %1624 = vpow2.f32 %v947_v15  ;;  %vm982_vm0 = vcmp.ge.f32.partialorder %v2122_v63, 0.0 }
 0x4e1   :  { %v872_v48 = vmul.f32 %v2127_v12, %v864_v6  ;;  %v858_v37 = vmul.f32 1.0614054, %v2134_v41  ;;  %v1613_v43 = vpop.eup %1612  ;;  %1626 = vpow2.f32 %v949_v55  ;;  %v955_v6 = vmul.f32 1.442695, %v941_v8 }
 0x4e2   :  { %v879_v52 = vadd.f32 1.4214138, %v871_v42  ;;  %v865_v54 = vadd.f32 -1.4531521, %v857_v45  ;;  %1628 = vpow2.f32 %v951_v56  ;;  %v804_v60 = vmul.f32 0.5, %v2100_v49 }
 0x4e3   :  { %v880_v59 = vadd.f32 1.4214138, %v872_v48  ;;  %v866_v62 = vadd.f32 -1.4531521, %v858_v37  ;;  %v2147_v35 = vpop.eup %1614  ;;  %1630 = vpow2.f32 %v953_v19 }
 0x4e4   :  { %v887_v20 = vmul.f32 %v2124_v14, %v879_v52  ;;  %v873_v18 = vmul.f32 %v2132_v36, %v865_v54  ;;  %v2149_v39 = vpop.eup %1616  ;;  %v859_v40 = vmul.f32 1.0614054, %v2147_v35  ;;  %1632 = vpow2.f32 %v955_v6 }
 0x4e5   :  { %v888_v44 = vmul.f32 %v2127_v12, %v880_v59  ;;  %v874_v27 = vmul.f32 %v2134_v41, %v866_v62  ;;  %v860_v15 = vmul.f32 1.0614054, %v2149_v39 }
 0x4e6   :  { %v895_v28 = vadd.f32 -0.28449672, %v887_v20  ;;  %v881_v34 = vadd.f32 1.4214138, %v873_v18  ;;  %v867_v50 = vadd.f32 -1.4531521, %v859_v40 }
 0x4e7   :  { %v896_v2 = vadd.f32 -0.28449672, %v888_v44  ;;  %v882_v30 = vadd.f32 1.4214138, %v874_v27  ;;  %v2157_v52 = vpop.eup %1618  ;;  %v868_v46 = vadd.f32 -1.4531521, %v860_v15 }
 0x4e8   :  { %v903_v17 = vmul.f32 %v2124_v14, %v895_v28  ;;  %v889_v23 = vmul.f32 %v2132_v36, %v881_v34  ;;  %v875_v21 = vmul.f32 %v2147_v35, %v867_v50  ;;  %v861_v8 = vmul.f32 1.0614054, %v2157_v52  ;;  %v2165_v20 = vpop.eup %1620 }
 0x4e9   :  { %v904_v42 = vmul.f32 %v2127_v12, %v896_v2  ;;  %v890_v45 = vmul.f32 %v2134_v41, %v882_v30  ;;  %v876_v44 = vmul.f32 %v2149_v39, %v868_v46  ;;  %v957_v27 = vmul.f32 1.442695, %v942_v33  ;;  %v1623_v0 = vpop.eup %1622 }
 0x4ea   :  { %v911_v48 = vadd.f32 0.2548296, %v903_v17  ;;  %v897_v37 = vadd.f32 -0.28449672, %v889_v23  ;;  %v883_v34 = vadd.f32 1.4214138, %v875_v21  ;;  %v1625_v23 = vpop.eup %1624 }
 0x4eb   :  { %v912_v54 = vadd.f32 0.2548296, %v904_v42  ;;  %v898_v55 = vadd.f32 -0.28449672, %v890_v45  ;;  %v869_v19 = vadd.f32 -1.4531521, %v861_v8  ;;  %v1627_v15 = vpop.eup %1626  ;;  %1634 = vpow2.f32 %v957_v27 }
 0x4ec   :  { %v919_v59 = vmul.f32 %v2124_v14, %v911_v48  ;;  %v905_v62 = vmul.f32 %v2132_v36, %v897_v37  ;;  %v884_v6 = vadd.f32 1.4214138, %v876_v44  ;;  %v862_v17 = vmul.f32 1.0614054, %v2165_v20  ;;  %v1629_v50 = vpop.eup %1628 }
 0x4ed   :  { %v920_v18 = vmul.f32 %v2127_v12, %v912_v54  ;;  %v906_v56 = vmul.f32 %v2134_v41, %v898_v55  ;;  %v891_v42 = vmul.f32 %v2147_v35, %v883_v34  ;;  %v877_v45 = vmul.f32 %v2157_v52, %v869_v19 }
 0x4ee   :  { %v959_v28 = vmul.f32 %v1613_v43, %v919_v59  ;;  %v913_v14 = vadd.f32 0.2548296, %v905_v62  ;;  %v892_v48 = vmul.f32 %v2149_v39, %v884_v6  ;;  %v870_v37 = vadd.f32 -1.4531521, %v862_v17 }
 0x4ef   :  { %v960_v2 = vmul.f32 %v1623_v0, %v920_v18  ;;  %v914_v30 = vadd.f32 0.2548296, %v906_v56  ;;  %v899_v46 = vadd.f32 -0.28449672, %v891_v42  ;;  %v885_v59 = vadd.f32 1.4214138, %v877_v45  ;;  %v1631_v18 = vpop.eup %1630 }
 0x4f0   :  { %v967_v40 = vsub.f32 1.0, %v959_v28  ;;  %v921_v12 = vmul.f32 %v2132_v36, %v913_v14  ;;  %v900_v8 = vadd.f32 -0.28449672, %v892_v48  ;;  %v878_v36 = vmul.f32 %v2165_v20, %v870_v37  ;;  %v1633_v28 = vpop.eup %1632 }
 0x4f1   :  { %v968_v43 = vsub.f32 1.0, %v960_v2  ;;  %v922_v33 = vmul.f32 %v2134_v41, %v914_v30  ;;  %v907_v41 = vmul.f32 %v2147_v35, %v899_v46  ;;  %v893_v0 = vmul.f32 %v2157_v52, %v885_v59 }
 0x4f2   :  { %v983_v54 = vsub.f32 0.0, %v967_v40  ;;  %v961_v55 = vmul.f32 %v1625_v23, %v921_v12  ;;  %v908_v19 = vmul.f32 %v2149_v39, %v900_v8  ;;  %v802_v27 = vmul.f32 0.5, %v2088_v29 }
 0x4f3   :  { %v984_v62 = vsub.f32 0.0, %v968_v43  ;;  %v962_v21 = vmul.f32 %v1627_v15, %v922_v33  ;;  %v915_v30 = vadd.f32 0.2548296, %v907_v41  ;;  %v901_v6 = vadd.f32 -0.28449672, %v893_v0 }
 0x4f4   :  { %v991_v56 = vsel %vm975_vm9, %v967_v40, %v983_v54  ;;  %v969_v44 = vsub.f32 1.0, %v961_v55  ;;  %v916_v23 = vadd.f32 0.2548296, %v908_v19  ;;  %v886_v40 = vadd.f32 1.4214138, %v878_v36 }
 0x4f5   :  { %v992_v14 = vsel %vm976_vm10, %v968_v43, %v984_v62  ;;  %v970_v34 = vsub.f32 1.0, %v962_v21  ;;  %v999_v9 = vadd.f32 1.0, %v991_v56  ;;  %v923_v22 = vmul.f32 %v2147_v35, %v915_v30  ;;  %v1635_v41 = vpop.eup %1634 }
 0x4f6   :  { %v985_v2 = vsub.f32 0.0, %v969_v44  ;;  %v1000_v12 = vadd.f32 1.0, %v992_v14  ;;  %v909_v45 = vmul.f32 %v2157_v52, %v901_v6  ;;  %v924_v43 = vmul.f32 %v2149_v39, %v916_v23 }
 0x4f7   :  { %v986_v17 = vsub.f32 0.0, %v970_v34  ;;  %v894_v33 = vmul.f32 %v2165_v20, %v886_v40  ;;  %v963_v37 = vmul.f32 %v1629_v50, %v923_v22  ;;  %v1007_v55 = vmul.f32 %v999_v9, %v2114_v58 }
 0x4f8   :  { %v993_v42 = vsel %vm977_vm11, %v969_v44, %v985_v2  ;;  %v917_v54 = vadd.f32 0.2548296, %v909_v45  ;;  %v964_v46 = vmul.f32 %v1631_v18, %v924_v43  ;;  %v1008_v35 = vmul.f32 %v1000_v12, %v2119_v61 }
 0x4f9   :  { %v1001_v15 = vadd.f32 1.0, %v993_v42  ;;  %v994_v1 = vsel %vm978_vm12, %v970_v34, %v986_v17  ;;  %v902_v59 = vadd.f32 -0.28449672, %v894_v33  ;;  %v971_v21 = vsub.f32 1.0, %v963_v37 }
 0x4fa   :  { %v1002_v48 = vadd.f32 1.0, %v994_v1  ;;  %v925_v8 = vmul.f32 %v2157_v52, %v917_v54  ;;  %v972_v36 = vsub.f32 1.0, %v964_v46  ;;  %v803_v19 = vmul.f32 0.5, %v2098_v47 }
 0x4fb   :  { %v1009_v10 = vmul.f32 %v1001_v15, %v2144_v26  ;;  %v910_v56 = vmul.f32 %v2165_v20, %v902_v59  ;;  %v987_v29 = vsub.f32 0.0, %v971_v21  ;;  %v805_v2 = vmul.f32 0.5, %v2109_v16  ;;  %v2210_v16 = vld [vmem:[%s2385_s11] sm:$0xff] }
 0x4fc   :  { %v1010_v62 = vmul.f32 %v1002_v48, %v802_v27  ;;  %v965_v44 = vmul.f32 %v1633_v28, %v925_v8  ;;  %v988_v0 = vsub.f32 0.0, %v972_v36  ;;  %v806_v47 = vmul.f32 0.5, %v2112_v57  ;;  %v1121_v27 = vpop.permute.xlu0 %1120 }
 0x4fd   :  { %v1574_v39 = vpack.c.bf16 %v1009_v10, %v1007_v55  ;;  %v918_v58 = vadd.f32 0.2548296, %v910_v56  ;;  %v995_v26 = vsel %vm979_vm13, %v971_v21, %v987_v29 }
 0x4fe   :  { %v1572_v50 = vpack.c.bf16 %v1010_v62, %v1008_v35  ;;  %v973_v18 = vsub.f32 1.0, %v965_v44  ;;  %v1003_v52 = vadd.f32 1.0, %v995_v26  ;;  %v996_v51 = vsel %vm980_vm15, %v972_v36, %v988_v0 }
 0x4ff   :  { %v926_v61 = vmul.f32 %v2165_v20, %v918_v58  ;;  %v1004_v20 = vadd.f32 1.0, %v996_v51 }
 0x500   :  { %1573 = vmatprep.subr.bf16.mxu1 %v1572_v50  ;;  %v989_v14 = vsub.f32 0.0, %v973_v18  ;;  %v1011_v9 = vmul.f32 %v1003_v52, %v803_v19 }
 0x501   :  { %1575 = vmatpush1.bf16.msra.mxu1 %v1574_v39  ;;  %v966_v34 = vmul.f32 %v1635_v41, %v926_v61  ;;  %v1012_v53 = vmul.f32 %v1004_v20, %v804_v60 }
 0x502   :  { %v997_v28 = vsel %vm981_vm14, %v973_v18, %v989_v14 }
 0x503   :  { %v1005_v30 = vadd.f32 1.0, %v997_v28  ;;  %v974_v6 = vsub.f32 1.0, %v966_v34  ;;  %v1131_v28 = vpop.permute.xlu0 %1130 }
 0x505   :  { %v1013_v17 = vmul.f32 %v1005_v30, %v805_v2  ;;  %v990_v23 = vsub.f32 0.0, %v974_v6 }
 0x507   :  { %v1578_v40 = vpack.c.bf16 %v1013_v17, %v1011_v9  ;;  %v998_v12 = vsel %vm982_vm0, %v974_v6, %v990_v23 }
 0x508   :  { %v1006_v42 = vadd.f32 1.0, %v998_v12 }
 0x50a   :  { %v1014_v22 = vmul.f32 %v1006_v42, %v806_v47 }
 0x50c   :  { %v1576_v45 = vpack.c.bf16 %v1014_v22, %v1012_v53 }
 0x50e   :  { %1577 = vmatprep.subr.bf16.mxu1 %v1576_v45 }
 0x50f   :  { %1579 = vmatpush1.bf16.msra.mxu1 %v1578_v40 }
 0x510   :  { %1145 = vmatprep.subr.mxu1 %v2046_v3 }
 0x512   :  { %1564 = vmatmul.mubr.msk.f32.vlgmr.msra.gmra.mrb[2].mxu1 %vm1022_vm1, %v2210_v16 }
 0x513   :  { %1146 = vmatpush1.msra.mxu1 %v2044_v38  ;;  %1209 = vmatprep.mubr.f32.mxu1 %v1676_v4  ;;  %v1116_v38 = vpop.permute.xlu1 %1115 }
 0x516   :  { %1565 = vmatmul.mubr.msk.f32.vlgmr.msra.gmra.mrb[4].mxu1 %vm389_vm8, %v2051_v5 }
 0x517   :  { %1215 = vmatprep.mubr.f32.mxu1 %v1676_v4  ;;  %v1126_v3 = vpop.permute.xlu1 %1125 }
 0x51a   :  { %1566 = vmatmul.mubr.msk.f32.gmra.mrb[6].mxu1 %vm389_vm8, %v2059_v11 }
 0x51b   :  { %1221 = vmatprep.mubr.f32.mxu1 %v1676_v4  ;;  %v1020_v49 = vpop.permute.xlu1 %1019 }
 0x51e   :  { %1567 = vmatmul.mubr.msk.f32.gmra.mrb[8].mxu1 %vm389_vm8, %v2067_v13 }
 0x51f   :  { %1227 = vmatprep.mubr.f32.mxu1 %v1676_v4 }
 0x522   :  { %1568 = vmatmul.mubr.msk.f32.gmra.mrb[10].mxu1 %vm389_vm8, %v2075_v7 }
 0x5e5   :  { %v1092_v57 = vpop.f32.mrb[2].mxu1 }
 0x5e6   :  { %v1093_v5 = vadd.f32 %v1092_v57, %v1020_v49  ;;  %v1094_v63 = vpop.f32.mrb[3].mxu1 }
 0x5e7   :  { %v1095_v15 = vadd.f32 %v1094_v63, %v1020_v49 }
 0x5e8   :  { %v1097_v1 = vadd.f32 %v1093_v5, %v1996_v24 }
 0x5e9   :  { %v1098_v11 = vadd.f32 %v1095_v15, %v1999_v25  ;;  %v1211_v43 = vpop.f32.mrb[4].mxu1 }
 0x5ea   :  { %1099 = vst [vmem:[%s2386_s13] sm:$0xff] %v1097_v1  ;;  %v1212_v4 = vadd.f32 %v1211_v43, %v1116_v38  ;;  %v1213_v13 = vpop.f32.mrb[5].mxu1 }
 0x5eb   :  { %1100 = vst [vmem:[%s2386_s13 + $0x8] sm:$0xff] %v1098_v11  ;;  %v1214_v7 = vadd.f32 %v1213_v13, %v1116_v38 }
 0x5ec   :  { %v2236_v33 = vmul.f32 0.70710677, %v1212_v4  ;;  %v2270_v20 = vmul.f32 0.5, %v1212_v4 }
 0x5ed   :  { %v2238_v48 = vmul.f32 0.70710677, %v1214_v7  ;;  %v1217_v24 = vpop.f32.mrb[6].mxu1  ;;  %v2275_v47 = vmul.f32 0.5, %v1214_v7 }
 0x5ee   :  { %v1250_v25 = vand.u32 2147483647, %v2236_v33  ;;  %v2241_v37 = vadd.f32 %v1217_v24, %v1121_v27  ;;  %v1219_v54 = vpop.f32.mrb[7].mxu1  ;;  %vm1410_vm2 = vcmp.ge.f32.partialorder %v2236_v33, 0.0 }
 0x5ef   :  { %v1251_v55 = vand.u32 2147483647, %v2238_v48  ;;  %v2244_v10 = vadd.f32 %v1219_v54, %v1121_v27  ;;  %vm1411_vm3 = vcmp.ge.f32.partialorder %v2238_v48, 0.0 }
 0x5f0   :  { %v1258_v46 = vmul.f32 0.3275911, %v1250_v25  ;;  %v2247_v59 = vmul.f32 0.70710677, %v2241_v37  ;;  %v1362_v8 = vsub.f32 0.0, %v1250_v25 }
 0x5f1   :  { %v1259_v35 = vmul.f32 0.3275911, %v1251_v55  ;;  %v2250_v62 = vmul.f32 0.70710677, %v2244_v10  ;;  %v1223_v36 = vpop.f32.mrb[8].mxu1  ;;  %v1363_v34 = vsub.f32 0.0, %v1251_v55 }
 0x5f2   :  { %v1266_v21 = vadd.f32 1.0, %v1258_v46  ;;  %v1252_v39 = vand.u32 2147483647, %v2247_v59  ;;  %v1225_v44 = vpop.f32.mrb[9].mxu1  ;;  %v1370_v26 = vmul.f32 %v1362_v8, %v1250_v25  ;;  %v2254_v0 = vadd.f32 %v1223_v36, %v1126_v3 }
 0x5f3   :  { %v1267_v56 = vadd.f32 1.0, %v1259_v35  ;;  %v1253_v29 = vand.u32 2147483647, %v2250_v62  ;;  %v2256_v52 = vadd.f32 %v1225_v44, %v1126_v3  ;;  %v1371_v40 = vmul.f32 %v1363_v34, %v1251_v55 }
 0x5f4   :  { %1636 = vrcp.f32 %v1266_v21  ;;  %v1260_v50 = vmul.f32 0.3275911, %v1252_v39  ;;  %v2259_v19 = vmul.f32 0.70710677, %v2254_v0  ;;  %v1378_v2 = vmul.f32 1.442695, %v1370_v26 }
 0x5f5   :  { %1638 = vrcp.f32 %v1267_v56  ;;  %v1261_v58 = vmul.f32 0.3275911, %v1253_v29  ;;  %v1229_v41 = vpop.f32.mrb[10].mxu1  ;;  %v2262_v51 = vmul.f32 0.70710677, %v2256_v52  ;;  %v1364_v30 = vsub.f32 0.0, %v1252_v39 }
 0x5f6   :  { %v1268_v18 = vadd.f32 1.0, %v1260_v50  ;;  %v1231_v61 = vpop.f32.mrb[11].mxu1  ;;  %v1254_v6 = vand.u32 2147483647, %v2259_v19  ;;  %v2265_v9 = vadd.f32 %v1229_v41, %v1131_v28  ;;  %v1365_v42 = vsub.f32 0.0, %v1253_v29 }
 0x5f7   :  { %v1269_v14 = vadd.f32 1.0, %v1261_v58  ;;  %v1255_v17 = vand.u32 2147483647, %v2262_v51  ;;  %v2268_v23 = vadd.f32 %v1231_v61, %v1131_v28  ;;  %v1372_v38 = vmul.f32 %v1364_v30, %v1252_v39 }
 0x5f8   :  { %1640 = vrcp.f32 %v1268_v18  ;;  %v1262_v12 = vmul.f32 0.3275911, %v1254_v6  ;;  %v2273_v60 = vmul.f32 0.70710677, %v2265_v9  ;;  %v1366_v63 = vsub.f32 0.0, %v1254_v6 }
 0x5f9   :  { %1642 = vrcp.f32 %v1269_v14  ;;  %v1263_v53 = vmul.f32 0.3275911, %v1255_v17  ;;  %v2278_v22 = vmul.f32 0.70710677, %v2268_v23  ;;  %v1380_v43 = vmul.f32 1.442695, %v1371_v40 }
 0x5fa   :  { %1644 = vpow2.f32 %v1378_v2  ;;  %v1270_v3 = vadd.f32 1.0, %v1262_v12  ;;  %v1256_v49 = vand.u32 2147483647, %v2273_v60  ;;  %v1373_v7 = vmul.f32 %v1365_v42, %v1253_v29 }
 0x5fb   :  { %v1271_v15 = vadd.f32 1.0, %v1263_v53  ;;  %v1257_v1 = vand.u32 2147483647, %v2278_v22  ;;  %v1367_v27 = vsub.f32 0.0, %v1255_v17  ;;  %v1382_v39 = vmul.f32 1.442695, %v1372_v38 }
 0x5fc   :  { %1646 = vrcp.f32 %v1270_v3  ;;  %v1264_v4 = vmul.f32 0.3275911, %v1256_v49  ;;  %v1368_v55 = vsub.f32 0.0, %v1256_v49  ;;  %v1374_v36 = vmul.f32 %v1366_v63, %v1254_v6 }
 0x5fd   :  { %1648 = vrcp.f32 %v1271_v15  ;;  %v1265_v46 = vmul.f32 0.3275911, %v1257_v1  ;;  %v1384_v41 = vmul.f32 1.442695, %v1373_v7  ;;  %v1375_v26 = vmul.f32 %v1367_v27, %v1255_v17 }
 0x5fe   :  { %v2280_v45 = vpop.eup %1636  ;;  %v1272_v54 = vadd.f32 1.0, %v1264_v4  ;;  %v1376_v14 = vmul.f32 %v1368_v55, %v1256_v49  ;;  %v1386_v2 = vmul.f32 1.442695, %v1374_v36  ;;  %v2300_v40 = vmul.f32 0.5, %v2241_v37 }
 0x5ff   :  { %v2283_v57 = vpop.eup %1638  ;;  %v1290_v5 = vmul.f32 1.0614054, %v2280_v45  ;;  %v1273_v44 = vadd.f32 1.0, %v1265_v46  ;;  %v1369_v42 = vsub.f32 0.0, %v1257_v1  ;;  %v1388_v38 = vmul.f32 1.442695, %v1375_v26 }
 0x600   :  { %v1291_v11 = vmul.f32 1.0614054, %v2283_v57  ;;  %1650 = vrcp.f32 %v1272_v54  ;;  %v1390_v63 = vmul.f32 1.442695, %v1376_v14  ;;  %vm1412_vm4 = vcmp.ge.f32.partialorder %v2247_v59, 0.0 }
 0x601   :  { %v1298_v13 = vadd.f32 -1.4531521, %v1290_v5  ;;  %1652 = vrcp.f32 %v1273_v44  ;;  %v1377_v27 = vmul.f32 %v1369_v42, %v1257_v1  ;;  %vm1413_vm5 = vcmp.ge.f32.partialorder %v2250_v62, 0.0 }
 0x602   :  { %v2288_v24 = vpop.eup %1640  ;;  %v1299_v25 = vadd.f32 -1.4531521, %v1291_v11  ;;  %1654 = vpow2.f32 %v1380_v43  ;;  %vm1414_vm6 = vcmp.ge.f32.partialorder %v2259_v19, 0.0  ;;  %vm1416_vm7 = vcmp.ge.f32.partialorder %v2273_v60, 0.0 }
 0x603   :  { %v2290_v35 = vpop.eup %1642  ;;  %v1306_v21 = vmul.f32 %v2280_v45, %v1298_v13  ;;  %v1292_v8 = vmul.f32 1.0614054, %v2288_v24  ;;  %1656 = vpow2.f32 %v1382_v39  ;;  %v1392_v26 = vmul.f32 1.442695, %v1377_v27 }
 0x604   :  { %v1307_v56 = vmul.f32 %v2283_v57, %v1299_v25  ;;  %v1293_v29 = vmul.f32 1.0614054, %v2290_v35  ;;  %v1645_v30 = vpop.eup %1644  ;;  %1658 = vpow2.f32 %v1384_v41  ;;  %vm1415_vm8 = vcmp.ge.f32.partialorder %v2262_v51, 0.0 }
 0x605   :  { %v1314_v50 = vadd.f32 1.4214138, %v1306_v21  ;;  %v1300_v58 = vadd.f32 -1.4531521, %v1292_v8  ;;  %1660 = vpow2.f32 %v1386_v2  ;;  %vm1417_vm9 = vcmp.ge.f32.partialorder %v2278_v22, 0.0 }
 0x606   :  { %v1315_v18 = vadd.f32 1.4214138, %v1307_v56  ;;  %v1301_v61 = vadd.f32 -1.4531521, %v1293_v29  ;;  %v2303_v3 = vpop.eup %1646  ;;  %1662 = vpow2.f32 %v1388_v38  ;;  %v1239_v60 = vmul.f32 0.5, %v2256_v52 }
 0x607   :  { %v1322_v34 = vmul.f32 %v2280_v45, %v1314_v50  ;;  %v1308_v28 = vmul.f32 %v2288_v24, %v1300_v58  ;;  %v2305_v15 = vpop.eup %1648  ;;  %v1294_v43 = vmul.f32 1.0614054, %v2303_v3  ;;  %1664 = vpow2.f32 %v1390_v63 }
 0x608   :  { %v1323_v6 = vmul.f32 %v2283_v57, %v1315_v18  ;;  %v1309_v12 = vmul.f32 %v2290_v35, %v1301_v61  ;;  %v1295_v7 = vmul.f32 1.0614054, %v2305_v15  ;;  %1666 = vpow2.f32 %v1392_v26 }
 0x609   :  { %v1330_v17 = vadd.f32 -0.28449672, %v1322_v34  ;;  %v1316_v53 = vadd.f32 1.4214138, %v1308_v28  ;;  %v1302_v55 = vadd.f32 -1.4531521, %v1294_v43 }
 0x60a   :  { %v1331_v49 = vadd.f32 -0.28449672, %v1323_v6  ;;  %v1317_v5 = vadd.f32 1.4214138, %v1309_v12  ;;  %v2313_v46 = vpop.eup %1650  ;;  %v1303_v39 = vadd.f32 -1.4531521, %v1295_v7 }
 0x60b   :  { %v1338_v11 = vmul.f32 %v2280_v45, %v1330_v17  ;;  %v1324_v37 = vmul.f32 %v2288_v24, %v1316_v53  ;;  %v1310_v1 = vmul.f32 %v2303_v3, %v1302_v55  ;;  %v1296_v29 = vmul.f32 1.0614054, %v2313_v46  ;;  %v2321_v44 = vpop.eup %1652 }
 0x60c   :  { %v1339_v4 = vmul.f32 %v2283_v57, %v1331_v49  ;;  %v1325_v13 = vmul.f32 %v2290_v35, %v1317_v5  ;;  %v1311_v41 = vmul.f32 %v2305_v15, %v1303_v39  ;;  %v1655_v18 = vpop.eup %1654  ;;  %v1297_v12 = vmul.f32 1.0614054, %v2321_v44 }
 0x60d   :  { %v1346_v25 = vadd.f32 0.2548296, %v1338_v11  ;;  %v1332_v54 = vadd.f32 -0.28449672, %v1324_v37  ;;  %v1318_v14 = vadd.f32 1.4214138, %v1310_v1  ;;  %v1657_v42 = vpop.eup %1656 }
 0x60e   :  { %v1347_v21 = vadd.f32 0.2548296, %v1339_v4  ;;  %v1333_v8 = vadd.f32 -0.28449672, %v1325_v13  ;;  %v1304_v34 = vadd.f32 -1.4531521, %v1296_v29  ;;  %v1659_v49 = vpop.eup %1658 }
 0x60f   :  { %v1354_v36 = vmul.f32 %v2280_v45, %v1346_v25  ;;  %v1340_v56 = vmul.f32 %v2288_v24, %v1332_v54  ;;  %v1319_v6 = vadd.f32 1.4214138, %v1311_v41  ;;  %v1326_v53 = vmul.f32 %v2303_v3, %v1318_v14  ;;  %v1661_v37 = vpop.eup %1660 }
 0x610   :  { %v1355_v50 = vmul.f32 %v2283_v57, %v1347_v21  ;;  %v1341_v58 = vmul.f32 %v2290_v35, %v1333_v8  ;;  %v1312_v38 = vmul.f32 %v2313_v46, %v1304_v34  ;;  %v1305_v11 = vadd.f32 -1.4531521, %v1297_v12  ;;  %v1663_v55 = vpop.eup %1662 }
 0x611   :  { %v1394_v61 = vmul.f32 %v1645_v30, %v1354_v36  ;;  %v1348_v45 = vadd.f32 0.2548296, %v1340_v56  ;;  %v1327_v63 = vmul.f32 %v2305_v15, %v1319_v6  ;;  %v1334_v13 = vadd.f32 -0.28449672, %v1326_v53  ;;  %v1665_v36 = vpop.eup %1664 }
 0x612   :  { %v1395_v28 = vmul.f32 %v1655_v18, %v1355_v50  ;;  %v1349_v2 = vadd.f32 0.2548296, %v1341_v58  ;;  %v1320_v7 = vadd.f32 1.4214138, %v1312_v38  ;;  %v1237_v26 = vmul.f32 0.5, %v2244_v10 }
 0x613   :  { %v1402_v17 = vsub.f32 1.0, %v1394_v61  ;;  %v1356_v57 = vmul.f32 %v2288_v24, %v1348_v45  ;;  %v1335_v54 = vadd.f32 -0.28449672, %v1327_v63  ;;  %v1313_v24 = vmul.f32 %v2321_v44, %v1305_v11 }
 0x614   :  { %v1403_v30 = vsub.f32 1.0, %v1395_v28  ;;  %v1357_v5 = vmul.f32 %v2290_v35, %v1349_v2  ;;  %v1342_v35 = vmul.f32 %v2303_v3, %v1334_v13  ;;  %v1328_v39 = vmul.f32 %v2313_v46, %v1320_v7  ;;  %v1667_v13 = vpop.eup %1666 }
 0x615   :  { %v1418_v43 = vsub.f32 0.0, %v1402_v17  ;;  %v1396_v4 = vmul.f32 %v1657_v42, %v1356_v57  ;;  %v1343_v29 = vmul.f32 %v2305_v15, %v1335_v54  ;;  %v1321_v45 = vadd.f32 1.4214138, %v1313_v24 }
 0x616   :  { %v1419_v27 = vsub.f32 0.0, %v1403_v30  ;;  %v1397_v25 = vmul.f32 %v1659_v49, %v1357_v5  ;;  %v1350_v58 = vadd.f32 0.2548296, %v1342_v35  ;;  %v1336_v41 = vadd.f32 -0.28449672, %v1328_v39 }
 0x617   :  { %v1426_v21 = vsel %vm1410_vm2, %v1402_v17, %v1418_v43  ;;  %v1404_v8 = vsub.f32 1.0, %v1396_v4  ;;  %v1351_v61 = vadd.f32 0.2548296, %v1343_v29  ;;  %v1329_v12 = vmul.f32 %v2321_v44, %v1321_v45 }
 0x618   :  { %v1427_v56 = vsel %vm1411_vm3, %v1403_v30, %v1419_v27  ;;  %v1405_v1 = vsub.f32 1.0, %v1397_v25  ;;  %v1434_v33 = vadd.f32 1.0, %v1426_v21  ;;  %v1358_v48 = vmul.f32 %v2303_v3, %v1350_v58 }
 0x619   :  { %v1420_v50 = vsub.f32 0.0, %v1404_v8  ;;  %v1435_v14 = vadd.f32 1.0, %v1427_v56  ;;  %v1344_v28 = vmul.f32 %v2313_v46, %v1336_v41  ;;  %v1359_v6 = vmul.f32 %v2305_v15, %v1351_v61 }
 0x61a   :  { %v1421_v18 = vsub.f32 0.0, %v1405_v1  ;;  %v1398_v17 = vmul.f32 %v1661_v37, %v1358_v48  ;;  %v1442_v53 = vmul.f32 %v1434_v33, %v2270_v20  ;;  %v1337_v49 = vadd.f32 -0.28449672, %v1329_v12 }
 0x61b   :  { %v1428_v34 = vsel %vm1412_vm4, %v1404_v8, %v1420_v50  ;;  %v1352_v57 = vadd.f32 0.2548296, %v1344_v28  ;;  %v1399_v38 = vmul.f32 %v1663_v55, %v1359_v6  ;;  %v1443_v3 = vmul.f32 %v1435_v14, %v2275_v47 }
 0x61c   :  { %v1436_v2 = vadd.f32 1.0, %v1428_v34  ;;  %v1429_v62 = vsel %vm1413_vm5, %v1405_v1, %v1421_v18  ;;  %v1406_v5 = vsub.f32 1.0, %v1398_v17  ;;  %v1345_v43 = vmul.f32 %v2321_v44, %v1337_v49 }
 0x61d   :  { %v1437_v42 = vadd.f32 1.0, %v1429_v62  ;;  %v1360_v63 = vmul.f32 %v2313_v46, %v1352_v57  ;;  %v1407_v11 = vsub.f32 1.0, %v1399_v38  ;;  %v1238_v24 = vmul.f32 0.5, %v2254_v0 }
 0x61e   :  { %v1444_v59 = vmul.f32 %v1436_v2, %v2300_v40  ;;  %v1422_v10 = vsub.f32 0.0, %v1406_v5  ;;  %v1353_v20 = vadd.f32 0.2548296, %v1345_v43  ;;  %v1240_v21 = vmul.f32 0.5, %v2265_v9  ;;  %v1455_v9 = vpop.permute.xlu0 %1454 }
 0x61f   :  { %v1445_v30 = vmul.f32 %v1437_v42, %v1237_v26  ;;  %v1400_v4 = vmul.f32 %v1665_v36, %v1360_v63  ;;  %v1423_v27 = vsub.f32 0.0, %v1407_v11  ;;  %v1241_v0 = vmul.f32 0.5, %v2268_v23 }
 0x620   :  { %v1582_v15 = vpack.c.bf16 %v1444_v59, %v1442_v53  ;;  %v1430_v40 = vsel %vm1414_vm6, %v1406_v5, %v1422_v10  ;;  %v1361_v47 = vmul.f32 %v2321_v44, %v1353_v20 }
 0x621   :  { %v1580_v37 = vpack.c.bf16 %v1445_v30, %v1443_v3  ;;  %v1408_v7 = vsub.f32 1.0, %v1400_v4  ;;  %v1438_v46 = vadd.f32 1.0, %v1430_v40  ;;  %v1431_v19 = vsel %vm1415_vm8, %v1407_v11, %v1423_v27 }
 0x622   :  { %v1401_v54 = vmul.f32 %v1667_v13, %v1361_v47  ;;  %v1439_v44 = vadd.f32 1.0, %v1431_v19 }
 0x623   :  { %1581 = vmatprep.subr.bf16.mxu0 %v1580_v37  ;;  %v1424_v25 = vsub.f32 0.0, %v1408_v7  ;;  %v1446_v39 = vmul.f32 %v1438_v46, %v1238_v24 }
 0x624   :  { %1583 = vmatpush1.bf16.msra.mxu0 %v1582_v15  ;;  %v1409_v35 = vsub.f32 1.0, %v1401_v54  ;;  %v1447_v51 = vmul.f32 %v1439_v44, %v1239_v60 }
 0x625   :  { %v1432_v55 = vsel %vm1416_vm7, %v1408_v7, %v1424_v25 }
 0x626   :  { %v1440_v8 = vadd.f32 1.0, %v1432_v55  ;;  %v1425_v56 = vsub.f32 0.0, %v1409_v35 }
 0x628   :  { %v1448_v36 = vmul.f32 %v1440_v8, %v1240_v21  ;;  %v1433_v29 = vsel %vm1417_vm9, %v1409_v35, %v1425_v56 }
 0x629   :  { %v1441_v50 = vadd.f32 1.0, %v1433_v29 }
 0x62a   :  { %v1586_v1 = vpack.c.bf16 %v1448_v36, %v1446_v39 }
 0x62b   :  { %v1449_v58 = vmul.f32 %v1441_v50, %v1241_v0 }
 0x62d   :  { %v1584_v41 = vpack.c.bf16 %v1449_v58, %v1447_v51 }
 0x62f   :  { %1585 = vmatprep.subr.bf16.mxu0 %v1584_v41 }
 0x630   :  { %1587 = vmatpush1.bf16.msra.mxu0 %v1586_v1 }
 0x633   :  { %1569 = vmatmul.mubr.msk.f32.vlgmr.msra.gmra.mrb[10].mxu0 %vm1022_vm1, %v2210_v16 }
 0x706   :  { %v1526_v33 = vpop.f32.mrb[10].mxu0 }
 0x707   :  { %v1527_v18 = vadd.f32 %v1526_v33, %v1455_v9  ;;  %v1528_v61 = vpop.f32.mrb[11].mxu0 }
 0x708   :  { %v1529_v22 = vadd.f32 %v1528_v61, %v1455_v9 }
 0x709   :  { %v1531_v45 = vadd.f32 %v1527_v18, %v2004_v31 }
 0x70a   :  { %v1532_v52 = vadd.f32 %v1529_v22, %v2007_v32 }
 0x70b   :  { %1570 = vst [vmem:[%s2386_s13 + $0x10] sm:$0xff] %v1531_v45 }
 0x70c   :  { %1571 = vst [vmem:[%s2386_s13 + $0x18] sm:$0xff] %v1532_v52 }

</bundles_post_ra>
